<compile_context>
chip_gen: v7x
topology: tpu7x:2x2x1
jax: 0.10.0
libtpu: 0.0.40
codegen_flags: <defaults>
</compile_context>

<pallas_src>
import functools

import jax
import jax.numpy as jnp
import numpy as np
from jax.experimental import pallas as pl
from jax.experimental.pallas import tpu as pltpu

LN_EPS = 1e-5  # PyTorch nn.LayerNorm default


def _erf(x):
    # Abramowitz & Stegun 7.1.26 polynomial approx of erf (max abs err ~1.5e-7), built
    # only from ops Mosaic lowers natively (exp goes to the EUP slot).
    a1, a2, a3, a4, a5 = 0.254829592, -0.284496736, 1.421413741, -1.453152027, 1.061405429
    p = 0.3275911
    z = jnp.abs(x)
    t = 1.0 / (1.0 + p * z)
    poly = ((((a5 * t + a4) * t + a3) * t + a2) * t + a1) * t
    r = 1.0 - poly * jnp.exp(-z * z)
    return jnp.where(x >= 0.0, r, -r)


def _gelu_exact(x):
    # Matches PyTorch nn.GELU() default (erf-based, not tanh approximation).
    return 0.5 * x * (1.0 + _erf(x * 0.7071067811865476))


def _layernorm_f32(x, gamma, beta):
    # Upcast to f32 only for the statistics; gamma/beta are (1, C) so broadcasting is 2-D.
    xf = x.astype(jnp.float32)
    mean = jnp.mean(xf, axis=-1, keepdims=True)
    var = jnp.mean(jnp.square(xf - mean), axis=-1, keepdims=True)
    return (xf - mean) * jax.lax.rsqrt(var + LN_EPS) * gamma + beta


def block_kernel(x_ref, n1g_ref, n1b_ref, qkvw_ref, projw_ref, projb_ref,
                 n2g_ref, n2b_ref, fc1w_ref, fc1b_ref, fc2w_ref, fc2b_ref,
                 o_ref, attn_slab_ref, *, num_heads, scale):
    x = x_ref[0]                                   # (N, C), residual stream in input dtype
    N, C = x.shape
    H = num_heads
    hd = C // H

    # ---------------- attention branch: x + proj(softmax(qk^T)v) ----------------
    h = _layernorm_f32(x, n1g_ref[...], n1b_ref[...])                       # (N, C) f32
    qkv = jnp.dot(h.astype(jnp.bfloat16), qkvw_ref[...],
                  preferred_element_type=jnp.float32)                       # (N, 3C) f32
    q = qkv[:, 0 * C:1 * C] * scale                # fold 1/sqrt(hd) into q once
    k = qkv[:, 1 * C:2 * C]
    v = qkv[:, 2 * C:3 * C]

    def split_heads(t):
        # (N, C) -> (H, N, hd) via static lane slices stacked on a new leading axis.
        return jnp.stack([t[:, hh * hd:(hh + 1) * hd] for hh in range(H)], axis=0)

    qh = split_heads(q).astype(jnp.bfloat16)
    kh = split_heads(k).astype(jnp.bfloat16)
    vh = split_heads(v).astype(jnp.bfloat16)

    # Batched over heads: one dot_general for QK^T, one for PV (no per-head MXU drain).
    logits = jnp.einsum('hqd,hkd->hqk', qh, kh,
                        preferred_element_type=jnp.float32)                 # (H, N, N) f32
    m = jnp.max(logits, axis=-1, keepdims=True)
    p = jnp.exp(logits - m)                                                 # unnormalized
    rowsum = jnp.sum(p, axis=-1, keepdims=True)                             # (H, N, 1) f32
    ctx = jnp.einsum('hqk,hkd->hqd', p.astype(jnp.bfloat16), vh,
                     preferred_element_type=jnp.float32)                    # (H, N, hd) f32
    ctx = ctx * pl.reciprocal(rowsum, approx=True)                          # deferred softmax norm

    # Scatter each head's context into a preallocated (N, C) VMEM slab (no concatenate).
    for hh in range(H):
        attn_slab_ref[:, hh * hd:(hh + 1) * hd] = ctx[hh]

    attn = jnp.dot(attn_slab_ref[...].astype(jnp.bfloat16), projw_ref[...],
                   preferred_element_type=jnp.float32) + projb_ref[...]     # (N, C) f32
    x1 = x + attn                                                           # f32 residual

    # ---------------- MLP branch: x1 + fc2(gelu(fc1(ln(x1)))) ----------------
    h2 = _layernorm_f32(x1, n2g_ref[...], n2b_ref[...])
    a = jnp.dot(h2.astype(jnp.bfloat16), fc1w_ref[...],
                preferred_element_type=jnp.float32) + fc1b_ref[...]         # (N, hidden) f32
    g = _gelu_exact(a)
    mlp = jnp.dot(g.astype(jnp.bfloat16), fc2w_ref[...],
                  preferred_element_type=jnp.float32) + fc2b_ref[...]       # (N, C) f32

    o_ref[0] = (x1 + mlp).astype(o_ref.dtype)


def block_forward(x, params, *, num_heads):
    B, N, C = x.shape
    scale = (C // num_heads) ** -0.5
    kernel = functools.partial(block_kernel, num_heads=num_heads, scale=scale)

    bf16 = jnp.bfloat16
    # Linear weights are pre-transposed (in, out) and cast to bf16 for the MXU;
    # LayerNorm params and biases stay f32 (added on the f32 accumulators).
    weights = [
        params["norm1_g"], params["norm1_b"],
        params["qkv_w_t"].astype(bf16), params["proj_w_t"].astype(bf16), params["proj_b"],
        params["norm2_g"], params["norm2_b"],
        params["fc1_w_t"].astype(bf16), params["fc1_b"],
        params["fc2_w_t"].astype(bf16), params["fc2_b"],
    ]

    def full_spec(arr):
        # Whole-array block with a grid-invariant index map: fetched once, resident in
        # VMEM across all B grid steps.
        return pl.BlockSpec(arr.shape, lambda b: (0,) * arr.ndim)

    in_specs = [pl.BlockSpec((1, N, C), lambda b: (b, 0, 0))] + [full_spec(w) for w in weights]

    return pl.pallas_call(
        kernel,
        out_shape=jax.ShapeDtypeStruct((B, N, C), x.dtype),
        grid=(B,),
        in_specs=in_specs,
        out_specs=pl.BlockSpec((1, N, C), lambda b: (b, 0, 0)),
        scratch_shapes=[pltpu.VMEM((N, C), jnp.float32)],     # per-head context slab
        compiler_params=pltpu.CompilerParams(
            dimension_semantics=("parallel",),
            vmem_limit_bytes=64 * 1024 * 1024,                # explicit scoped-VMEM limit
        ),
    )(x, *weights)


def block_reference(x, params, num_heads):
    """Pure-JAX f32 mirror of the PyTorch Block.forward (eval mode, drop ratios = 0)."""
    B, N, C = x.shape
    hd = C // num_heads
    scale = hd ** -0.5

    def ln(t, g, b):
        m = jnp.mean(t, axis=-1, keepdims=True)
        v = jnp.mean((t - m) ** 2, axis=-1, keepdims=True)
        return (t - m) / jnp.sqrt(v + LN_EPS) * g + b

    h = ln(x, params["norm1_g"][0], params["norm1_b"][0])
    qkv = (h @ params["qkv_w_t"]).reshape(B, N, 3, num_heads, hd).transpose(2, 0, 3, 1, 4)
    q, k, v = qkv[0], qkv[1], qkv[2]
    attn = jax.nn.softmax((q @ jnp.swapaxes(k, -1, -2)) * scale, axis=-1)
    o = (attn @ v).transpose(0, 2, 1, 3).reshape(B, N, C)
    o = o @ params["proj_w_t"] + params["proj_b"][0]
    x1 = x + o

    h2 = ln(x1, params["norm2_g"][0], params["norm2_b"][0])
    a = h2 @ params["fc1_w_t"] + params["fc1_b"][0]
    g = 0.5 * a * (1.0 + jax.scipy.special.erf(a / jnp.sqrt(2.0)))  # exact GELU
    m = g @ params["fc2_w_t"] + params["fc2_b"][0]
    return x1 + m


if __name__ == "__main__":
    B, N, C = 2, 8, 32
    num_heads = 4
    mlp_ratio = 4.0
    hidden = int(C * mlp_ratio)

    key = jax.random.PRNGKey(0)
    ks = jax.random.split(key, 8)
    params = {
        "norm1_g": jnp.ones((1, C), jnp.float32),
        "norm1_b": jnp.zeros((1, C), jnp.float32),
        "qkv_w_t": 0.02 * jax.random.normal(ks[0], (C, 3 * C), jnp.float32),   # qkv_bias=False
        "proj_w_t": 0.02 * jax.random.normal(ks[1], (C, C), jnp.float32),
        "proj_b": 0.01 * jax.random.normal(ks[2], (1, C), jnp.float32),
        "norm2_g": jnp.ones((1, C), jnp.float32),
        "norm2_b": jnp.zeros((1, C), jnp.float32),
        "fc1_w_t": 0.02 * jax.random.normal(ks[3], (C, hidden), jnp.float32),
        "fc1_b": 0.01 * jax.random.normal(ks[4], (1, hidden), jnp.float32),
        "fc2_w_t": 0.02 * jax.random.normal(ks[5], (hidden, C), jnp.float32),
        "fc2_b": 0.01 * jax.random.normal(ks[6], (1, C), jnp.float32),
    }
    x = jax.random.normal(ks[7], (B, N, C), jnp.float32)

    out = jax.block_until_ready(block_forward(x, params, num_heads=num_heads))
    ref = jax.block_until_ready(block_reference(x, params, num_heads))

    # Tolerance relaxed vs. the pure-f32 version: kernel matmuls use bf16 MXU operands
    # (f32 accumulation), which introduces ~1e-3-level differences against the f32 ref.
    np.testing.assert_allclose(np.asarray(out), np.asarray(ref), rtol=2e-2, atol=2e-2)

    print("KERNEL_OK")
</pallas_src>

<mosaic_0001>
module attributes {stable_mosaic.version = 11 : i64} {
  func.func @block_kernel(%arg0: i32, %arg1: memref<1x8x32xf32, #tpu.memory_space<vmem>>, %arg2: memref<1x32xf32, #tpu.memory_space<vmem>>, %arg3: memref<1x32xf32, #tpu.memory_space<vmem>>, %arg4: memref<32x96xbf16, #tpu.memory_space<vmem>>, %arg5: memref<32x32xbf16, #tpu.memory_space<vmem>>, %arg6: memref<1x32xf32, #tpu.memory_space<vmem>>, %arg7: memref<1x32xf32, #tpu.memory_space<vmem>>, %arg8: memref<1x32xf32, #tpu.memory_space<vmem>>, %arg9: memref<32x128xbf16, #tpu.memory_space<vmem>>, %arg10: memref<1x128xf32, #tpu.memory_space<vmem>>, %arg11: memref<128x32xbf16, #tpu.memory_space<vmem>>, %arg12: memref<1x32xf32, #tpu.memory_space<vmem>>, %arg13: memref<1x8x32xf32, #tpu.memory_space<vmem>>, %arg14: memref<8x32xf32, #tpu.memory_space<vmem>>) attributes {dimension_semantics = [#tpu.dimension_semantics<parallel>], iteration_bounds = array<i64: 2>, scalar_prefetch = 0 : i64, scratch_operands = 1 : i64, tpu.core_type = #tpu.core_type<tc>, window_params = [{transform_indices = @transform_0, window_bounds = array<i64: 1, 8, 32>}, {pipeline_mode = #tpu.pipeline_mode<synchronous>, transform_indices = @transform_1, window_bounds = array<i64: 1, 32>}, {pipeline_mode = #tpu.pipeline_mode<synchronous>, transform_indices = @transform_2, window_bounds = array<i64: 1, 32>}, {pipeline_mode = #tpu.pipeline_mode<synchronous>, transform_indices = @transform_3, window_bounds = array<i64: 32, 96>}, {pipeline_mode = #tpu.pipeline_mode<synchronous>, transform_indices = @transform_4, window_bounds = array<i64: 32, 32>}, {pipeline_mode = #tpu.pipeline_mode<synchronous>, transform_indices = @transform_5, window_bounds = array<i64: 1, 32>}, {pipeline_mode = #tpu.pipeline_mode<synchronous>, transform_indices = @transform_6, window_bounds = array<i64: 1, 32>}, {pipeline_mode = #tpu.pipeline_mode<synchronous>, transform_indices = @transform_7, window_bounds = array<i64: 1, 32>}, {pipeline_mode = #tpu.pipeline_mode<synchronous>, transform_indices = @transform_8, window_bounds = array<i64: 32, 128>}, {pipeline_mode = #tpu.pipeline_mode<synchronous>, transform_indices = @transform_9, window_bounds = array<i64: 1, 128>}, {pipeline_mode = #tpu.pipeline_mode<synchronous>, transform_indices = @transform_10, window_bounds = array<i64: 128, 32>}, {pipeline_mode = #tpu.pipeline_mode<synchronous>, transform_indices = @transform_11, window_bounds = array<i64: 1, 32>}, {transform_indices = @transform_12, window_bounds = array<i64: 1, 8, 32>}]} {
    %c0 = arith.constant 0 : index
    %c0_0 = arith.constant 0 : index
    %c0_1 = arith.constant 0 : index
    %0 = vector.load %arg1[%c0, %c0_0, %c0_1] : memref<1x8x32xf32, #tpu.memory_space<vmem>>, vector<1x8x32xf32>
    %1 = vector.shape_cast %0 : vector<1x8x32xf32> to vector<8x32xf32>
    %c0_2 = arith.constant 0 : index
    %c0_3 = arith.constant 0 : index
    %2 = vector.load %arg2[%c0_2, %c0_3] : memref<1x32xf32, #tpu.memory_space<vmem>>, vector<1x32xf32>
    %c0_4 = arith.constant 0 : index
    %c0_5 = arith.constant 0 : index
    %3 = vector.load %arg3[%c0_4, %c0_5] : memref<1x32xf32, #tpu.memory_space<vmem>>, vector<1x32xf32>
    %cst = arith.constant dense<0.000000e+00> : vector<8xf32>
    %4 = vector.multi_reduction <add>, %1, %cst [1] : vector<8x32xf32> to vector<8xf32>
    %5 = vector.shape_cast %4 : vector<8xf32> to vector<8x1xf32>
    %cst_6 = arith.constant 3.200000e+01 : f32
    %6 = vector.broadcast %cst_6 : f32 to vector<8x1xf32>
    %7 = arith.divf %5, %6 : vector<8x1xf32>
    %8 = vector.broadcast %7 : vector<8x1xf32> to vector<8x32xf32>
    %9 = arith.subf %1, %8 : vector<8x32xf32>
    %10 = arith.mulf %9, %9 : vector<8x32xf32>
    %cst_7 = arith.constant dense<0.000000e+00> : vector<8xf32>
    %11 = vector.multi_reduction <add>, %10, %cst_7 [1] : vector<8x32xf32> to vector<8xf32>
    %12 = vector.shape_cast %11 : vector<8xf32> to vector<8x1xf32>
    %cst_8 = arith.constant 3.200000e+01 : f32
    %13 = vector.broadcast %cst_8 : f32 to vector<8x1xf32>
    %14 = arith.divf %12, %13 : vector<8x1xf32>
    %15 = vector.broadcast %7 : vector<8x1xf32> to vector<8x32xf32>
    %16 = arith.subf %1, %15 : vector<8x32xf32>
    %cst_9 = arith.constant 9.99999974E-6 : f32
    %17 = vector.broadcast %cst_9 : f32 to vector<8x1xf32>
    %18 = arith.addf %14, %17 : vector<8x1xf32>
    %19 = math.rsqrt %18 : vector<8x1xf32>
    %20 = vector.broadcast %19 : vector<8x1xf32> to vector<8x32xf32>
    %21 = arith.mulf %16, %20 : vector<8x32xf32>
    %22 = vector.broadcast %2 : vector<1x32xf32> to vector<8x32xf32>
    %23 = arith.mulf %21, %22 : vector<8x32xf32>
    %24 = vector.broadcast %3 : vector<1x32xf32> to vector<8x32xf32>
    %25 = arith.addf %23, %24 : vector<8x32xf32>
    %26 = arith.truncf %25 : vector<8x32xf32> to vector<8x32xbf16>
    %c0_10 = arith.constant 0 : index
    %c0_11 = arith.constant 0 : index
    %27 = vector.load %arg4[%c0_10, %c0_11] : memref<32x96xbf16, #tpu.memory_space<vmem>>, vector<32x96xbf16>
    %cst_12 = arith.constant dense<0.000000e+00> : vector<8x96xf32>
    %28 = tpu.matmul %26, %27, %cst_12 {dimension_numbers = #tpu.dot_dimension_numbers<[1], [0], [0], [1], [0, 0, 1, 1], [], []>} : vector<8x32xbf16>, vector<32x96xbf16>, vector<8x96xf32> -> vector<8x96xf32>
    %29 = vector.extract_strided_slice %28 {offsets = [0, 0], sizes = [8, 32], strides = [1, 1]} : vector<8x96xf32> to vector<8x32xf32>
    %cst_13 = arith.constant 0.353553385 : f32
    %30 = vector.broadcast %cst_13 : f32 to vector<8x32xf32>
    %31 = arith.mulf %29, %30 : vector<8x32xf32>
    %32 = vector.extract_strided_slice %28 {offsets = [0, 32], sizes = [8, 32], strides = [1, 1]} : vector<8x96xf32> to vector<8x32xf32>
    %33 = vector.extract_strided_slice %28 {offsets = [0, 64], sizes = [8, 32], strides = [1, 1]} : vector<8x96xf32> to vector<8x32xf32>
    %34 = vector.extract_strided_slice %31 {offsets = [0, 0], sizes = [8, 8], strides = [1, 1]} : vector<8x32xf32> to vector<8x8xf32>
    %35 = vector.extract_strided_slice %31 {offsets = [0, 8], sizes = [8, 8], strides = [1, 1]} : vector<8x32xf32> to vector<8x8xf32>
    %36 = vector.extract_strided_slice %31 {offsets = [0, 16], sizes = [8, 8], strides = [1, 1]} : vector<8x32xf32> to vector<8x8xf32>
    %37 = vector.extract_strided_slice %31 {offsets = [0, 24], sizes = [8, 8], strides = [1, 1]} : vector<8x32xf32> to vector<8x8xf32>
    %38 = vector.shape_cast %34 : vector<8x8xf32> to vector<1x8x8xf32>
    %39 = vector.shape_cast %35 : vector<8x8xf32> to vector<1x8x8xf32>
    %40 = vector.shape_cast %36 : vector<8x8xf32> to vector<1x8x8xf32>
    %41 = vector.shape_cast %37 : vector<8x8xf32> to vector<1x8x8xf32>
    %42 = tpu.concatenate %38, %39, %40, %41 in 0 : vector<1x8x8xf32>, vector<1x8x8xf32>, vector<1x8x8xf32>, vector<1x8x8xf32> -> vector<4x8x8xf32>
    %43 = arith.truncf %42 : vector<4x8x8xf32> to vector<4x8x8xbf16>
    %44 = vector.extract_strided_slice %32 {offsets = [0, 0], sizes = [8, 8], strides = [1, 1]} : vector<8x32xf32> to vector<8x8xf32>
    %45 = vector.extract_strided_slice %32 {offsets = [0, 8], sizes = [8, 8], strides = [1, 1]} : vector<8x32xf32> to vector<8x8xf32>
    %46 = vector.extract_strided_slice %32 {offsets = [0, 16], sizes = [8, 8], strides = [1, 1]} : vector<8x32xf32> to vector<8x8xf32>
    %47 = vector.extract_strided_slice %32 {offsets = [0, 24], sizes = [8, 8], strides = [1, 1]} : vector<8x32xf32> to vector<8x8xf32>
    %48 = vector.shape_cast %44 : vector<8x8xf32> to vector<1x8x8xf32>
    %49 = vector.shape_cast %45 : vector<8x8xf32> to vector<1x8x8xf32>
    %50 = vector.shape_cast %46 : vector<8x8xf32> to vector<1x8x8xf32>
    %51 = vector.shape_cast %47 : vector<8x8xf32> to vector<1x8x8xf32>
    %52 = tpu.concatenate %48, %49, %50, %51 in 0 : vector<1x8x8xf32>, vector<1x8x8xf32>, vector<1x8x8xf32>, vector<1x8x8xf32> -> vector<4x8x8xf32>
    %53 = arith.truncf %52 : vector<4x8x8xf32> to vector<4x8x8xbf16>
    %54 = vector.extract_strided_slice %33 {offsets = [0, 0], sizes = [8, 8], strides = [1, 1]} : vector<8x32xf32> to vector<8x8xf32>
    %55 = vector.extract_strided_slice %33 {offsets = [0, 8], sizes = [8, 8], strides = [1, 1]} : vector<8x32xf32> to vector<8x8xf32>
    %56 = vector.extract_strided_slice %33 {offsets = [0, 16], sizes = [8, 8], strides = [1, 1]} : vector<8x32xf32> to vector<8x8xf32>
    %57 = vector.extract_strided_slice %33 {offsets = [0, 24], sizes = [8, 8], strides = [1, 1]} : vector<8x32xf32> to vector<8x8xf32>
    %58 = vector.shape_cast %54 : vector<8x8xf32> to vector<1x8x8xf32>
    %59 = vector.shape_cast %55 : vector<8x8xf32> to vector<1x8x8xf32>
    %60 = vector.shape_cast %56 : vector<8x8xf32> to vector<1x8x8xf32>
    %61 = vector.shape_cast %57 : vector<8x8xf32> to vector<1x8x8xf32>
    %62 = tpu.concatenate %58, %59, %60, %61 in 0 : vector<1x8x8xf32>, vector<1x8x8xf32>, vector<1x8x8xf32>, vector<1x8x8xf32> -> vector<4x8x8xf32>
    %63 = arith.truncf %62 : vector<4x8x8xf32> to vector<4x8x8xbf16>
    "tpu.trace_start"() <{level = 10 : i32, message = "hqd,hkd->hqk"}> : () -> ()
    %cst_14 = arith.constant dense<0.000000e+00> : vector<4x8x8xf32>
    %64 = tpu.matmul %43, %53, %cst_14 {dimension_numbers = #tpu.dot_dimension_numbers<[2], [2], [1], [1], [0, 0, 0, 1, 1, 1], [0], [0]>} : vector<4x8x8xbf16>, vector<4x8x8xbf16>, vector<4x8x8xf32> -> vector<4x8x8xf32>
    "tpu.trace_stop"() : () -> ()
    %cst_15 = arith.constant dense<0xFF800000> : vector<4x8xf32>
    %65 = vector.multi_reduction <maximumf>, %64, %cst_15 [2] : vector<4x8x8xf32> to vector<4x8xf32>
    %66 = vector.shape_cast %65 : vector<4x8xf32> to vector<4x8x1xf32>
    %67 = vector.broadcast %66 : vector<4x8x1xf32> to vector<4x8x8xf32>
    %68 = arith.subf %64, %67 : vector<4x8x8xf32>
    %69 = math.exp %68 : vector<4x8x8xf32>
    %cst_16 = arith.constant dense<0.000000e+00> : vector<4x8xf32>
    %70 = vector.multi_reduction <add>, %69, %cst_16 [2] : vector<4x8x8xf32> to vector<4x8xf32>
    %71 = vector.shape_cast %70 : vector<4x8xf32> to vector<4x8x1xf32>
    %72 = arith.truncf %69 : vector<4x8x8xf32> to vector<4x8x8xbf16>
    "tpu.trace_start"() <{level = 10 : i32, message = "hqk,hkd->hqd"}> : () -> ()
    %cst_17 = arith.constant dense<0.000000e+00> : vector<4x8x8xf32>
    %73 = tpu.matmul %72, %63, %cst_17 {dimension_numbers = #tpu.dot_dimension_numbers<[2], [1], [1], [2], [0, 0, 0, 1, 1, 2], [0], [0]>} : vector<4x8x8xbf16>, vector<4x8x8xbf16>, vector<4x8x8xf32> -> vector<4x8x8xf32>
    "tpu.trace_stop"() : () -> ()
    %74 = tpu.reciprocal %71 {approx = true} : vector<4x8x1xf32> -> vector<4x8x1xf32>
    %75 = vector.broadcast %74 : vector<4x8x1xf32> to vector<4x8x8xf32>
    %76 = arith.mulf %73, %75 : vector<4x8x8xf32>
    %77 = vector.extract_strided_slice %76 {offsets = [0, 0, 0], sizes = [1, 8, 8], strides = [1, 1, 1]} : vector<4x8x8xf32> to vector<1x8x8xf32>
    %78 = vector.shape_cast %77 : vector<1x8x8xf32> to vector<8x8xf32>
    %c0_18 = arith.constant 0 : index
    %c0_19 = arith.constant 0 : index
    %79 = vector.load %arg14[%c0_18, %c0_19] : memref<8x32xf32, #tpu.memory_space<vmem>>, vector<8x8xf32>
    tpu.vector_store %arg14[%c0_18, %c0_19], %78 {strides = array<i32>} : memref<8x32xf32, #tpu.memory_space<vmem>>, vector<8x8xf32>,
    %80 = vector.extract_strided_slice %76 {offsets = [1, 0, 0], sizes = [1, 8, 8], strides = [1, 1, 1]} : vector<4x8x8xf32> to vector<1x8x8xf32>
    %81 = vector.shape_cast %80 : vector<1x8x8xf32> to vector<8x8xf32>
    %c0_20 = arith.constant 0 : index
    %c8 = arith.constant 8 : index
    %82 = vector.load %arg14[%c0_20, %c8] : memref<8x32xf32, #tpu.memory_space<vmem>>, vector<8x8xf32>
    tpu.vector_store %arg14[%c0_20, %c8], %81 {strides = array<i32>} : memref<8x32xf32, #tpu.memory_space<vmem>>, vector<8x8xf32>,
    %83 = vector.extract_strided_slice %76 {offsets = [2, 0, 0], sizes = [1, 8, 8], strides = [1, 1, 1]} : vector<4x8x8xf32> to vector<1x8x8xf32>
    %84 = vector.shape_cast %83 : vector<1x8x8xf32> to vector<8x8xf32>
    %c0_21 = arith.constant 0 : index
    %c16 = arith.constant 16 : index
    %85 = vector.load %arg14[%c0_21, %c16] : memref<8x32xf32, #tpu.memory_space<vmem>>, vector<8x8xf32>
    tpu.vector_store %arg14[%c0_21, %c16], %84 {strides = array<i32>} : memref<8x32xf32, #tpu.memory_space<vmem>>, vector<8x8xf32>,
    %86 = vector.extract_strided_slice %76 {offsets = [3, 0, 0], sizes = [1, 8, 8], strides = [1, 1, 1]} : vector<4x8x8xf32> to vector<1x8x8xf32>
    %87 = vector.shape_cast %86 : vector<1x8x8xf32> to vector<8x8xf32>
    %c0_22 = arith.constant 0 : index
    %c24 = arith.constant 24 : index
    %88 = vector.load %arg14[%c0_22, %c24] : memref<8x32xf32, #tpu.memory_space<vmem>>, vector<8x8xf32>
    tpu.vector_store %arg14[%c0_22, %c24], %87 {strides = array<i32>} : memref<8x32xf32, #tpu.memory_space<vmem>>, vector<8x8xf32>,
    %c0_23 = arith.constant 0 : index
    %c0_24 = arith.constant 0 : index
    %89 = vector.load %arg14[%c0_23, %c0_24] : memref<8x32xf32, #tpu.memory_space<vmem>>, vector<8x32xf32>
    %90 = arith.truncf %89 : vector<8x32xf32> to vector<8x32xbf16>
    %c0_25 = arith.constant 0 : index
    %c0_26 = arith.constant 0 : index
    %91 = vector.load %arg5[%c0_25, %c0_26] : memref<32x32xbf16, #tpu.memory_space<vmem>>, vector<32x32xbf16>
    %cst_27 = arith.constant dense<0.000000e+00> : vector<8x32xf32>
    %92 = tpu.matmul %90, %91, %cst_27 {dimension_numbers = #tpu.dot_dimension_numbers<[1], [0], [0], [1], [0, 0, 1, 1], [], []>} : vector<8x32xbf16>, vector<32x32xbf16>, vector<8x32xf32> -> vector<8x32xf32>
    %c0_28 = arith.constant 0 : index
    %c0_29 = arith.constant 0 : index
    %93 = vector.load %arg6[%c0_28, %c0_29] : memref<1x32xf32, #tpu.memory_space<vmem>>, vector<1x32xf32>
    %94 = vector.broadcast %93 : vector<1x32xf32> to vector<8x32xf32>
    %95 = arith.addf %92, %94 : vector<8x32xf32>
    %96 = arith.addf %1, %95 : vector<8x32xf32>
    %c0_30 = arith.constant 0 : index
    %c0_31 = arith.constant 0 : index
    %97 = vector.load %arg7[%c0_30, %c0_31] : memref<1x32xf32, #tpu.memory_space<vmem>>, vector<1x32xf32>
    %c0_32 = arith.constant 0 : index
    %c0_33 = arith.constant 0 : index
    %98 = vector.load %arg8[%c0_32, %c0_33] : memref<1x32xf32, #tpu.memory_space<vmem>>, vector<1x32xf32>
    %cst_34 = arith.constant dense<0.000000e+00> : vector<8xf32>
    %99 = vector.multi_reduction <add>, %96, %cst_34 [1] : vector<8x32xf32> to vector<8xf32>
    %100 = vector.shape_cast %99 : vector<8xf32> to vector<8x1xf32>
    %cst_35 = arith.constant 3.200000e+01 : f32
    %101 = vector.broadcast %cst_35 : f32 to vector<8x1xf32>
    %102 = arith.divf %100, %101 : vector<8x1xf32>
    %103 = vector.broadcast %102 : vector<8x1xf32> to vector<8x32xf32>
    %104 = arith.subf %96, %103 : vector<8x32xf32>
    %105 = arith.mulf %104, %104 : vector<8x32xf32>
    %cst_36 = arith.constant dense<0.000000e+00> : vector<8xf32>
    %106 = vector.multi_reduction <add>, %105, %cst_36 [1] : vector<8x32xf32> to vector<8xf32>
    %107 = vector.shape_cast %106 : vector<8xf32> to vector<8x1xf32>
    %cst_37 = arith.constant 3.200000e+01 : f32
    %108 = vector.broadcast %cst_37 : f32 to vector<8x1xf32>
    %109 = arith.divf %107, %108 : vector<8x1xf32>
    %110 = vector.broadcast %102 : vector<8x1xf32> to vector<8x32xf32>
    %111 = arith.subf %96, %110 : vector<8x32xf32>
    %cst_38 = arith.constant 9.99999974E-6 : f32
    %112 = vector.broadcast %cst_38 : f32 to vector<8x1xf32>
    %113 = arith.addf %109, %112 : vector<8x1xf32>
    %114 = math.rsqrt %113 : vector<8x1xf32>
    %115 = vector.broadcast %114 : vector<8x1xf32> to vector<8x32xf32>
    %116 = arith.mulf %111, %115 : vector<8x32xf32>
    %117 = vector.broadcast %97 : vector<1x32xf32> to vector<8x32xf32>
    %118 = arith.mulf %116, %117 : vector<8x32xf32>
    %119 = vector.broadcast %98 : vector<1x32xf32> to vector<8x32xf32>
    %120 = arith.addf %118, %119 : vector<8x32xf32>
    %121 = arith.truncf %120 : vector<8x32xf32> to vector<8x32xbf16>
    %c0_39 = arith.constant 0 : index
    %c0_40 = arith.constant 0 : index
    %122 = vector.load %arg9[%c0_39, %c0_40] : memref<32x128xbf16, #tpu.memory_space<vmem>>, vector<32x128xbf16>
    %cst_41 = arith.constant dense<0.000000e+00> : vector<8x128xf32>
    %123 = tpu.matmul %121, %122, %cst_41 {dimension_numbers = #tpu.dot_dimension_numbers<[1], [0], [0], [1], [0, 0, 1, 1], [], []>} : vector<8x32xbf16>, vector<32x128xbf16>, vector<8x128xf32> -> vector<8x128xf32>
    %c0_42 = arith.constant 0 : index
    %c0_43 = arith.constant 0 : index
    %124 = vector.load %arg10[%c0_42, %c0_43] : memref<1x128xf32, #tpu.memory_space<vmem>>, vector<1x128xf32>
    %125 = vector.broadcast %124 : vector<1x128xf32> to vector<8x128xf32>
    %126 = arith.addf %123, %125 : vector<8x128xf32>
    %cst_44 = arith.constant 5.000000e-01 : f32
    %127 = vector.broadcast %cst_44 : f32 to vector<8x128xf32>
    %128 = arith.mulf %127, %126 : vector<8x128xf32>
    %cst_45 = arith.constant 0.707106769 : f32
    %129 = vector.broadcast %cst_45 : f32 to vector<8x128xf32>
    %130 = arith.mulf %126, %129 : vector<8x128xf32>
    %131 = math.absf %130 : vector<8x128xf32>
    %cst_46 = arith.constant 0.327591091 : f32
    %132 = vector.broadcast %cst_46 : f32 to vector<8x128xf32>
    %133 = arith.mulf %132, %131 : vector<8x128xf32>
    %cst_47 = arith.constant 1.000000e+00 : f32
    %134 = vector.broadcast %cst_47 : f32 to vector<8x128xf32>
    %135 = arith.addf %134, %133 : vector<8x128xf32>
    %cst_48 = arith.constant 1.000000e+00 : f32
    %136 = vector.broadcast %cst_48 : f32 to vector<8x128xf32>
    %137 = arith.divf %136, %135 : vector<8x128xf32>
    %cst_49 = arith.constant 1.06140542 : f32
    %138 = vector.broadcast %cst_49 : f32 to vector<8x128xf32>
    %139 = arith.mulf %138, %137 : vector<8x128xf32>
    %cst_50 = arith.constant -1.45315206 : f32
    %140 = vector.broadcast %cst_50 : f32 to vector<8x128xf32>
    %141 = arith.addf %139, %140 : vector<8x128xf32>
    %142 = arith.mulf %141, %137 : vector<8x128xf32>
    %cst_51 = arith.constant 1.42141378 : f32
    %143 = vector.broadcast %cst_51 : f32 to vector<8x128xf32>
    %144 = arith.addf %142, %143 : vector<8x128xf32>
    %145 = arith.mulf %144, %137 : vector<8x128xf32>
    %cst_52 = arith.constant -0.284496725 : f32
    %146 = vector.broadcast %cst_52 : f32 to vector<8x128xf32>
    %147 = arith.addf %145, %146 : vector<8x128xf32>
    %148 = arith.mulf %147, %137 : vector<8x128xf32>
    %cst_53 = arith.constant 0.254829586 : f32
    %149 = vector.broadcast %cst_53 : f32 to vector<8x128xf32>
    %150 = arith.addf %148, %149 : vector<8x128xf32>
    %151 = arith.mulf %150, %137 : vector<8x128xf32>
    %cst_54 = arith.constant 0.000000e+00 : f32
    %152 = vector.broadcast %cst_54 : f32 to vector<8x128xf32>
    %153 = arith.subf %152, %131 : vector<8x128xf32>
    %154 = arith.mulf %153, %131 : vector<8x128xf32>
    %155 = math.exp %154 : vector<8x128xf32>
    %156 = arith.mulf %151, %155 : vector<8x128xf32>
    %cst_55 = arith.constant 1.000000e+00 : f32
    %157 = vector.broadcast %cst_55 : f32 to vector<8x128xf32>
    %158 = arith.subf %157, %156 : vector<8x128xf32>
    %cst_56 = arith.constant 0.000000e+00 : f32
    %159 = vector.broadcast %cst_56 : f32 to vector<8x128xf32>
    %160 = arith.cmpf oge, %130, %159 : vector<8x128xf32>
    %cst_57 = arith.constant 0.000000e+00 : f32
    %161 = vector.broadcast %cst_57 : f32 to vector<8x128xf32>
    %162 = arith.subf %161, %158 : vector<8x128xf32>
    %163 = arith.select %160, %158, %162 : vector<8x128xi1>, vector<8x128xf32>
    %cst_58 = arith.constant 1.000000e+00 : f32
    %164 = vector.broadcast %cst_58 : f32 to vector<8x128xf32>
    %165 = arith.addf %164, %163 : vector<8x128xf32>
    %166 = arith.mulf %128, %165 : vector<8x128xf32>
    %167 = arith.truncf %166 : vector<8x128xf32> to vector<8x128xbf16>
    %c0_59 = arith.constant 0 : index
    %c0_60 = arith.constant 0 : index
    %168 = vector.load %arg11[%c0_59, %c0_60] : memref<128x32xbf16, #tpu.memory_space<vmem>>, vector<128x32xbf16>
    %cst_61 = arith.constant dense<0.000000e+00> : vector<8x32xf32>
    %169 = tpu.matmul %167, %168, %cst_61 {dimension_numbers = #tpu.dot_dimension_numbers<[1], [0], [0], [1], [0, 0, 1, 1], [], []>} : vector<8x128xbf16>, vector<128x32xbf16>, vector<8x32xf32> -> vector<8x32xf32>
    %c0_62 = arith.constant 0 : index
    %c0_63 = arith.constant 0 : index
    %170 = vector.load %arg12[%c0_62, %c0_63] : memref<1x32xf32, #tpu.memory_space<vmem>>, vector<1x32xf32>
    %171 = vector.broadcast %170 : vector<1x32xf32> to vector<8x32xf32>
    %172 = arith.addf %169, %171 : vector<8x32xf32>
    %173 = arith.addf %96, %172 : vector<8x32xf32>
    %c0_64 = arith.constant 0 : index
    %c0_65 = arith.constant 0 : index
    %c0_66 = arith.constant 0 : index
    %174 = vector.load %arg13[%c0_64, %c0_65, %c0_66] : memref<1x8x32xf32, #tpu.memory_space<vmem>>, vector<1x8x32xf32>
    %175 = vector.shape_cast %174 : vector<1x8x32xf32> to vector<8x32xf32>
    %176 = vector.shape_cast %173 : vector<8x32xf32> to vector<1x8x32xf32>
    tpu.vector_store %arg13[%c0_64, %c0_65, %c0_66], %176 {strides = array<i32>} : memref<1x8x32xf32, #tpu.memory_space<vmem>>, vector<1x8x32xf32>,
    return
  }
  func.func @transform_0(%arg0: i32) -> (i32, i32, i32) {
    %c0_i32 = arith.constant 0 : i32
    %c0_i32_0 = arith.constant 0 : i32
    %c0_i32_1 = arith.constant 0 : i32
    return %arg0, %c0_i32, %c0_i32_0 : i32, i32, i32
  }
  func.func @transform_1(%arg0: i32) -> (i32, i32) {
    %c0_i32 = arith.constant 0 : i32
    %c0_i32_0 = arith.constant 0 : i32
    %c0_i32_1 = arith.constant 0 : i32
    return %c0_i32, %c0_i32_0 : i32, i32
  }
  func.func @transform_2(%arg0: i32) -> (i32, i32) {
    %c0_i32 = arith.constant 0 : i32
    %c0_i32_0 = arith.constant 0 : i32
    %c0_i32_1 = arith.constant 0 : i32
    return %c0_i32, %c0_i32_0 : i32, i32
  }
  func.func @transform_3(%arg0: i32) -> (i32, i32) {
    %c0_i32 = arith.constant 0 : i32
    %c0_i32_0 = arith.constant 0 : i32
    %c0_i32_1 = arith.constant 0 : i32
    return %c0_i32, %c0_i32_0 : i32, i32
  }
  func.func @transform_4(%arg0: i32) -> (i32, i32) {
    %c0_i32 = arith.constant 0 : i32
    %c0_i32_0 = arith.constant 0 : i32
    %c0_i32_1 = arith.constant 0 : i32
    return %c0_i32, %c0_i32_0 : i32, i32
  }
  func.func @transform_5(%arg0: i32) -> (i32, i32) {
    %c0_i32 = arith.constant 0 : i32
    %c0_i32_0 = arith.constant 0 : i32
    %c0_i32_1 = arith.constant 0 : i32
    return %c0_i32, %c0_i32_0 : i32, i32
  }
  func.func @transform_6(%arg0: i32) -> (i32, i32) {
    %c0_i32 = arith.constant 0 : i32
    %c0_i32_0 = arith.constant 0 : i32
    %c0_i32_1 = arith.constant 0 : i32
    return %c0_i32, %c0_i32_0 : i32, i32
  }
  func.func @transform_7(%arg0: i32) -> (i32, i32) {
    %c0_i32 = arith.constant 0 : i32
    %c0_i32_0 = arith.constant 0 : i32
    %c0_i32_1 = arith.constant 0 : i32
    return %c0_i32, %c0_i32_0 : i32, i32
  }
  func.func @transform_8(%arg0: i32) -> (i32, i32) {
    %c0_i32 = arith.constant 0 : i32
    %c0_i32_0 = arith.constant 0 : i32
    %c0_i32_1 = arith.constant 0 : i32
    return %c0_i32, %c0_i32_0 : i32, i32
  }
  func.func @transform_9(%arg0: i32) -> (i32, i32) {
    %c0_i32 = arith.constant 0 : i32
    %c0_i32_0 = arith.constant 0 : i32
    %c0_i32_1 = arith.constant 0 : i32
    return %c0_i32, %c0_i32_0 : i32, i32
  }
  func.func @transform_10(%arg0: i32) -> (i32, i32) {
    %c0_i32 = arith.constant 0 : i32
    %c0_i32_0 = arith.constant 0 : i32
    %c0_i32_1 = arith.constant 0 : i32
    return %c0_i32, %c0_i32_0 : i32, i32
  }
  func.func @transform_11(%arg0: i32) -> (i32, i32) {
    %c0_i32 = arith.constant 0 : i32
    %c0_i32_0 = arith.constant 0 : i32
    %c0_i32_1 = arith.constant 0 : i32
    return %c0_i32, %c0_i32_0 : i32, i32
  }
  func.func @transform_12(%arg0: i32) -> (i32, i32, i32) {
    %c0_i32 = arith.constant 0 : i32
    %c0_i32_0 = arith.constant 0 : i32
    %c0_i32_1 = arith.constant 0 : i32
    return %arg0, %c0_i32, %c0_i32_0 : i32, i32, i32
  }
}

</mosaic_0001>

<bundles_post_ra>
// kernel: tpu_custom_call.1
= control target key start
LH: loop header
LB: loop body
LE: loop exit
PB: predicated region body
PF: predicated region fallthrough
CT: control target
= control target key end

     0   :  { %s3103_s0 = inlined_call_operand.hbm [shape: f32[2,8,32], index: 0, kind: input, shape index: {}]   ;;  %s3104_s1 = inlined_call_operand.hbm [shape: f32[1,32], index: 1, kind: input, shape index: {}]   ;;  %s3105_s2 = inlined_call_operand.hbm [shape: f32[1,32], index: 2, kind: input, shape index: {}]   ;;  %s3106_s3 = inlined_call_operand.hbm [shape: bf16[32,96], index: 3, kind: input, shape index: {}]   ;;  %s3107_s4 = inlined_call_operand.hbm [shape: bf16[32,32], index: 4, kind: input, shape index: {}]   ;;  %s3108_s5 = inlined_call_operand.hbm [shape: f32[1,32], index: 5, kind: input, shape index: {}]   ;;  %s3109_s6 = inlined_call_operand.hbm [shape: f32[1,32], index: 6, kind: input, shape index: {}]   ;;  %s3110_s7 = inlined_call_operand.hbm [shape: f32[1,32], index: 7, kind: input, shape index: {}]   ;;  %s3111_s8 = inlined_call_operand.hbm [shape: bf16[32,128], index: 8, kind: input, shape index: {}]   ;;  %s3112_s9 = inlined_call_operand.hbm [shape: f32[1,128], index: 9, kind: input, shape index: {}]   ;;  %s3113_s10 = inlined_call_operand.hbm [shape: bf16[128,32], index: 10, kind: input, shape index: {}]   ;;  %s3114_s11 = inlined_call_operand.hbm [shape: f32[1,32], index: 11, kind: input, shape index: {}]   ;;  %s3115_s12 = inlined_call_operand.hbm [shape: f32[2,8,32], index: 12, kind: output, shape index: {}]  }
   0x1   :  { %3125 = sst [smem:[#allocation33_spill]] %s3104_s1 }
   0x2   :  { %3126 = sst [smem:[#allocation34_spill]] %s3105_s2 }
   0x3   :  { %3127 = sst [smem:[#allocation35_spill]] %s3106_s3 }
   0x4   :  { %3128 = sst [smem:[#allocation36_spill]] %s3115_s12 }
   0x5   :  { %17 = vsyncpa [#allocation4], 0 }
   0x6   :  { %19 = vsyncpa [#allocation4 + $0x1], 0 }
   0x7   :  { %20 = vsyncpa [#allocation7], 0 }
   0x8   :  { %21 = vsyncpa [#allocation10], 0 }
   0x9   :  { %22 = vsyncpa [#allocation13], 0 }
   0xa   :  { %23 = vsyncpa [#allocation16], 0 }
   0xb   :  { %24 = vsyncpa [#allocation19], 0 }
   0xc   :  { %25 = vsyncpa [#allocation22], 0 }
   0xd   :  { %26 = vsyncpa [#allocation5], 0 }
   0xe   :  { %28 = vsyncpa [#allocation5 + $0x1], 0  ;;  %s2568_s21 = smov 0   ;;  %s2570_s22 = smov 0  }
   0xf   :  { %s2572_s23 = smov 0   ;;  %s2574_s24 = smov 0  }
  0x10 LB: > { %s2478_s25 = smov [#allocation6]   ;;  %s2589_s27 = sadd.s32 4294967295, %s2476_s24   ;;  %s2476_s24 = sphi %s2574_s24, %s3164_s24   ;;  %s2472_s23 = sphi %s2572_s23, %s3163_s23   ;;  %s2468_s22 = sphi %s2570_s22, %s3162_s22   ;;  %s2464_s21 = sphi %s2568_s21, %s3161_s21  }
  0x11   : > { %s335_s26 = sshll.u32 %s2478_s25, 4  ;;  %p1650_p0 = scmp.ge.s32.totalorder %s2476_s24, 1  ;;  %s2594_s26 = int_to_ptr.vmem [resolvable:$true] %s335_s26 }
  0x12   : > { %p3122_p1 = scmp.eq.s32.totalorder %s2589_s27, 0  ;;  %p322_p2 = scmp.lt.s32.totalorder %s2476_s24, 3 }
  0x13   : > { %s2479_s29 = smov [#allocation9]   ;;  %s2480_s14 = smov [#allocation12]  }
  0x14   : > { %p2596_p3 = pnand %p1650_p0, %p322_p2  ;;  %s356_s30 = sshll.u32 %s2479_s29, 4  ;;  %s2603_s30 = int_to_ptr.vmem [resolvable:$true] %s356_s30 }
  0x15   : > { %s383_s15 = sshll.u32 %s2480_s14, 4  ;;  %s3132_s1 = sld [smem:[#allocation33_spill]]  ;;  %s2611_s15 = int_to_ptr.vmem [resolvable:$true] %s383_s15 }
  0x16   : > { %s3129_s28 = scalar_select %p2596_p3, 1, 0 }
  0x17   : > { %p1889_p5 = pneg %p2596_p3 }
  0x18   : > { %3130 = sst [smem:[#allocation32_spill]] %s3129_s28 }
  0x19   : > { %p2607_p6 = pnand %p1889_p5, %p3122_p1 }
  0x1b   : > { %s2048_s18 = scalar_lea.hbm %s3132_s1, 16  ;;  %p2621_p8 = pneg %p2607_p6 }
  0x1c   : > { %p2049_p7 = scmp.ne.s32.totalorder %s3132_s1, %s2048_s18  ;;  %p2055_p11 = scmp.lt.u32.totalorder %s2048_s18, %s3132_s1 }
  0x1e   : > { %p2051_p9 = pnand %p2621_p8, %p2049_p7 }
  0x20   : > { %p2052_p10 = pneg %p2051_p9 }
  0x22   : > { %p2057_p12 = pnand %p2055_p11, %p2052_p10 }
  0x24   : > { %2060 = shalt.err (!%p2057_p12)
}
  0x25   : > { %s2061_s16 = scalar_lea.vmem %s2594_s26, 16  ;;  %s2068_s17 = scalar_lea.vmem %s2594_s26, 32 }
  0x26   : > { %p2062_p13 = scmp.ne.s32.totalorder %s2594_s26, %s2061_s16  ;;  %p2069_p5 = scmp.lt.s32.totalorder %s2594_s26, %s2594_s26 }
  0x27   : > { %p2070_p7 = scmp.lt.s32.totalorder %s2068_s17, %s2061_s16 }
  0x28   : > { %p2064_p0 = pnand %p2062_p13, %p2621_p8 }
  0x29   : > { %p2071_p9 = por %p2070_p7, %p2069_p5 }
  0x2a   : > { %p2065_p2 = pneg %p2064_p0 }
  0x2c   : > { %p2072_p4 = pnand %p2071_p9, %p2065_p2 }
  0x2e   : > { %2075 = shalt.err (!%p2072_p4)
}
  0x2f   : > { %1892 = dma.hbm_to_vmem [thread:$0]  (!%p2607_p6), %s3132_s1, 16, %s2594_s26, [#allocation7]  }
  0x30   : > { %s3134_s3 = sld [smem:[#allocation35_spill]] }
  0x36   : > { %s2076_s14 = scalar_lea.hbm %s3134_s3, 256 }
  0x37   : > { %p2077_p10 = scmp.ne.s32.totalorder %s3134_s3, %s2076_s14  ;;  %p2083_p4 = scmp.lt.u32.totalorder %s2076_s14, %s3134_s3 }
  0x39   : > { %p2079_p11 = pnand %p2077_p10, %p2621_p8 }
  0x3b   : > { %p2080_p12 = pneg %p2079_p11 }
  0x3d   : > { %p2085_p13 = pnand %p2083_p4, %p2080_p12 }
  0x3f   : > { %2088 = shalt.err (!%p2085_p13)
}
  0x40   : > { %s2089_s26 = scalar_lea.vmem %s2603_s30, 256  ;;  %p2097_p7 = scmp.lt.s32.totalorder %s2603_s30, %s2603_s30 }
  0x41   : > { %p2090_p0 = scmp.ne.s32.totalorder %s2603_s30, %s2089_s26  ;;  %p2098_p9 = scmp.lt.s32.totalorder %s2089_s26, %s2089_s26 }
  0x43   : > { %p2092_p2 = pnand %p2090_p0, %p2621_p8  ;;  %p2099_p10 = por %p2098_p9, %p2097_p7 }
  0x45   : > { %p2093_p5 = pneg %p2092_p2 }
  0x47   : > { %p2100_p11 = pnand %p2099_p10, %p2093_p5 }
  0x49   : > { %2103 = shalt.err (!%p2100_p11)
}
  0x4a   : > { %s3118_s12 = smov 64   ;;  %s3120_s28 = smov 4  }
  0x4b   : > { %1898 = dma.hbm_to_vmem [thread:$0]  (!%p2607_p6), %s3134_s3, 256, %s2603_s30, [#allocation10], %s3118_s12, %s3118_s12, %s3120_s28  }
  0x4c   : > { %s2104_s14 = scalar_lea.hbm %s3108_s5, 16 }
  0x4d   : > { %p2105_p12 = scmp.ne.s32.totalorder %s3108_s5, %s2104_s14  ;;  %p2111_p0 = scmp.lt.u32.totalorder %s2104_s14, %s3108_s5 }
  0x4f   : > { %p2107_p4 = pnand %p2105_p12, %p2621_p8 }
  0x51   : > { %p2108_p13 = pneg %p2107_p4 }
  0x53   : > { %p2113_p2 = pnand %p2111_p0, %p2108_p13 }
  0x55   : > { %2116 = shalt.err (!%p2113_p2)
}
  0x56   : > { %s2117_s30 = scalar_lea.vmem %s2611_s15, 16  ;;  %s2124_s18 = scalar_lea.vmem %s2611_s15, 32 }
  0x57   : > { %p2118_p5 = scmp.ne.s32.totalorder %s2611_s15, %s2117_s30  ;;  %p2125_p10 = scmp.lt.s32.totalorder %s2611_s15, %s2611_s15 }
  0x58   : > { %p2126_p11 = scmp.lt.s32.totalorder %s2124_s18, %s2117_s30 }
  0x59   : > { %p2120_p7 = pnand %p2118_p5, %p2621_p8 }
  0x5a   : > { %p2127_p12 = por %p2126_p11, %p2125_p10 }
  0x5b   : > { %p2121_p9 = pneg %p2120_p7 }
  0x5d   : > { %p2128_p4 = pnand %p2127_p12, %p2121_p9 }
  0x5f   : > { %2131 = shalt.err (!%p2128_p4)
}
  0x60   : > { %1904 = dma.hbm_to_vmem [thread:$0]  (!%p2607_p6), %s3108_s5, 16, %s2611_s15, [#allocation13]  }
  0x61   : > { %s2483_s20 = smov [#allocation15]   ;;  %s2484_s14 = smov [#allocation18]  }
  0x62   : > { %s405_s29 = sshll.u32 %s2483_s20, 4  ;;  %s429_s16 = sshll.u32 %s2484_s14, 4  ;;  %s406_s29 = int_to_ptr.vmem [resolvable:$true] %s405_s29  ;;  %s430_s16 = int_to_ptr.vmem [resolvable:$true] %s429_s16 }
  0x63   : > { %s2132_s30 = scalar_lea.hbm %s3110_s7, 16 }
  0x64   : > { %p2133_p13 = scmp.ne.s32.totalorder %s3110_s7, %s2132_s30  ;;  %p2139_p5 = scmp.lt.u32.totalorder %s2132_s30, %s3110_s7 }
  0x66   : > { %p2135_p0 = pnand %p2133_p13, %p2621_p8 }
  0x68   : > { %p2136_p2 = pneg %p2135_p0 }
  0x6a   : > { %p2141_p7 = pnand %p2139_p5, %p2136_p2 }
  0x6c   : > { %2144 = shalt.err (!%p2141_p7)
}
  0x6d   : > { %s2145_s15 = scalar_lea.vmem %s406_s29, 16  ;;  %s2152_s19 = scalar_lea.vmem %s406_s29, 32 }
  0x6e   : > { %p2146_p9 = scmp.ne.s32.totalorder %s406_s29, %s2145_s15  ;;  %p2153_p12 = scmp.lt.s32.totalorder %s406_s29, %s406_s29 }
  0x6f   : > { %p2154_p4 = scmp.lt.s32.totalorder %s2152_s19, %s2145_s15 }
  0x70   : > { %p2148_p10 = pnand %p2146_p9, %p2621_p8 }
  0x71   : > { %p2155_p1 = por %p2154_p4, %p2153_p12 }
  0x72   : > { %p2149_p11 = pneg %p2148_p10 }
  0x74   : > { %p2156_p3 = pnand %p2155_p1, %p2149_p11 }
  0x76   : > { %2159 = shalt.err (!%p2156_p3)
}
  0x77   : > { %1910 = dma.hbm_to_vmem [thread:$0]  (!%p2607_p6), %s3110_s7, 16, %s406_s29, [#allocation16]  }
  0x78   : > { %s2160_s17 = scalar_lea.hbm %s3112_s9, 16 }
  0x79   : > { %p2161_p13 = scmp.ne.s32.totalorder %s3112_s9, %s2160_s17  ;;  %p2167_p3 = scmp.lt.u32.totalorder %s2160_s17, %s3112_s9 }
  0x7b   : > { %p2163_p0 = pnand %p2161_p13, %p2621_p8 }
  0x7d   : > { %p2164_p1 = pneg %p2163_p0 }
  0x7f   : > { %p2169_p2 = pnand %p2167_p3, %p2164_p1 }
  0x81   : > { %2172 = shalt.err (!%p2169_p2)
}
  0x82   : > { %s2173_s15 = scalar_lea.vmem %s430_s16, 16  ;;  %s2180_s29 = scalar_lea.vmem %s430_s16, 32 }
  0x83   : > { %p2174_p5 = scmp.ne.s32.totalorder %s430_s16, %s2173_s15  ;;  %p2181_p10 = scmp.lt.s32.totalorder %s430_s16, %s430_s16 }
  0x84   : > { %p2182_p11 = scmp.lt.s32.totalorder %s2180_s29, %s2173_s15 }
  0x85   : > { %p2176_p7 = pnand %p2174_p5, %p2621_p8 }
  0x86   : > { %p2183_p12 = por %p2182_p11, %p2181_p10 }
  0x87   : > { %p2177_p9 = pneg %p2176_p7 }
  0x89   : > { %p2184_p4 = pnand %p2183_p12, %p2177_p9 }
  0x8b   : > { %2187 = shalt.err (!%p2184_p4)
}
  0x8c   : > { %1916 = dma.hbm_to_vmem [thread:$0]  (!%p2607_p6), %s3112_s9, 16, %s430_s16, [#allocation19]  }
  0x8d   : > { %s2485_s20 = smov [#allocation8]   ;;  %s2486_s14 = smov [#allocation11]  }
  0x8e   : > { %s346_s28 = sshll.u32 %s2485_s20, 4  ;;  %s369_s17 = sshll.u32 %s2486_s14, 4  ;;  %s347_s28 = int_to_ptr.vmem [resolvable:$true] %s346_s28  ;;  %s370_s17 = int_to_ptr.vmem [resolvable:$true] %s369_s17 }
  0x8f   : > { %s3135_s2 = sld [smem:[#allocation34_spill]] }
  0x95   : > { %s2188_s18 = scalar_lea.hbm %s3135_s2, 16 }
  0x96   : > { %p2189_p13 = scmp.ne.s32.totalorder %s3135_s2, %s2188_s18  ;;  %p2195_p3 = scmp.lt.u32.totalorder %s2188_s18, %s3135_s2 }
  0x98   : > { %p2191_p0 = pnand %p2189_p13, %p2621_p8 }
  0x9a   : > { %p2192_p1 = pneg %p2191_p0 }
  0x9c   : > { %p2197_p2 = pnand %p2195_p3, %p2192_p1 }
  0x9e   : > { %2200 = shalt.err (!%p2197_p2)
}
  0x9f   : > { %s2201_s16 = scalar_lea.vmem %s347_s28, 16  ;;  %s2208_s12 = scalar_lea.vmem %s347_s28, 32 }
  0xa0   : > { %p2202_p5 = scmp.ne.s32.totalorder %s347_s28, %s2201_s16  ;;  %p2209_p10 = scmp.lt.s32.totalorder %s347_s28, %s347_s28 }
  0xa1   : > { %p2210_p11 = scmp.lt.s32.totalorder %s2208_s12, %s2201_s16 }
  0xa2   : > { %p2204_p7 = pnand %p2202_p5, %p2621_p8 }
  0xa3   : > { %p2211_p12 = por %p2210_p11, %p2209_p10 }
  0xa4   : > { %p2205_p9 = pneg %p2204_p7 }
  0xa6   : > { %p2212_p4 = pnand %p2211_p12, %p2205_p9 }
  0xa8   : > { %2215 = shalt.err (!%p2212_p4)
}
  0xa9   : > { %1895 = dma.hbm_to_vmem [thread:$0]  (!%p2607_p6), %s3135_s2, 16, %s347_s28, [#allocation7]  }
  0xaa   : > { %s2216_s18 = scalar_lea.hbm %s3107_s4, 256 }
  0xab   : > { %p2217_p13 = scmp.ne.s32.totalorder %s3107_s4, %s2216_s18  ;;  %p2223_p3 = scmp.lt.u32.totalorder %s2216_s18, %s3107_s4 }
  0xad   : > { %p2219_p0 = pnand %p2217_p13, %p2621_p8 }
  0xaf   : > { %p2220_p1 = pneg %p2219_p0 }
  0xb1   : > { %p2225_p2 = pnand %p2223_p3, %p2220_p1 }
  0xb3   : > { %2228 = shalt.err (!%p2225_p2)
}
  0xb4   : > { %s2229_s16 = scalar_lea.vmem %s370_s17, 256  ;;  %p2237_p10 = scmp.lt.s32.totalorder %s370_s17, %s370_s17 }
  0xb5   : > { %p2230_p5 = scmp.ne.s32.totalorder %s370_s17, %s2229_s16  ;;  %p2238_p11 = scmp.lt.s32.totalorder %s2229_s16, %s2229_s16 }
  0xb7   : > { %p2232_p7 = pnand %p2230_p5, %p2621_p8  ;;  %p2239_p12 = por %p2238_p11, %p2237_p10 }
  0xb9   : > { %p2233_p9 = pneg %p2232_p7 }
  0xbb   : > { %p2240_p4 = pnand %p2239_p12, %p2233_p9 }
  0xbd   : > { %2243 = shalt.err (!%p2240_p4)
}
  0xbe   : > { %s3136_s28 = smov 4   ;;  %s3137_s12 = smov 64  }
  0xbf   : > { %1901 = dma.hbm_to_vmem [thread:$0]  (!%p2607_p6), %s3107_s4, 256, %s370_s17, [#allocation10], %s3137_s12, %s3137_s12, %s3136_s28  }
  0xc0   : > { %s2487_s26 = smov [#allocation14]   ;;  %s2488_s18 = smov [#allocation17]  }
  0xc1   : > { %s394_s30 = sshll.u32 %s2487_s26, 4  ;;  %s415_s1 = sshll.u32 %s2488_s18, 4  ;;  %s395_s30 = int_to_ptr.vmem [resolvable:$true] %s394_s30  ;;  %s416_s1 = int_to_ptr.vmem [resolvable:$true] %s415_s1 }
  0xc2   : > { %s2244_s19 = scalar_lea.hbm %s3109_s6, 16 }
  0xc3   : > { %p2245_p13 = scmp.ne.s32.totalorder %s3109_s6, %s2244_s19  ;;  %p2251_p3 = scmp.lt.u32.totalorder %s2244_s19, %s3109_s6 }
  0xc5   : > { %p2247_p0 = pnand %p2245_p13, %p2621_p8 }
  0xc7   : > { %p2248_p1 = pneg %p2247_p0 }
  0xc9   : > { %p2253_p2 = pnand %p2251_p3, %p2248_p1 }
  0xcb   : > { %2256 = shalt.err (!%p2253_p2)
}
  0xcc   : > { %s2257_s17 = scalar_lea.vmem %s395_s30, 16  ;;  %s2264_s14 = scalar_lea.vmem %s395_s30, 32 }
  0xcd   : > { %p2258_p5 = scmp.ne.s32.totalorder %s395_s30, %s2257_s17  ;;  %p2265_p10 = scmp.lt.s32.totalorder %s395_s30, %s395_s30 }
  0xce   : > { %p2266_p11 = scmp.lt.s32.totalorder %s2264_s14, %s2257_s17 }
  0xcf   : > { %p2260_p7 = pnand %p2258_p5, %p2621_p8 }
  0xd0   : > { %p2267_p12 = por %p2266_p11, %p2265_p10 }
  0xd1   : > { %p2261_p9 = pneg %p2260_p7 }
  0xd3   : > { %p2268_p4 = pnand %p2267_p12, %p2261_p9 }
  0xd5   : > { %2271 = shalt.err (!%p2268_p4)
}
  0xd6   : > { %1907 = dma.hbm_to_vmem [thread:$0]  (!%p2607_p6), %s3109_s6, 16, %s395_s30, [#allocation13]  }
  0xd7   : > { %s2272_s15 = scalar_lea.hbm %s3111_s8, 256 }
  0xd8   : > { %p2273_p13 = scmp.ne.s32.totalorder %s3111_s8, %s2272_s15  ;;  %p2279_p3 = scmp.lt.u32.totalorder %s2272_s15, %s3111_s8 }
  0xda   : > { %p2275_p0 = pnand %p2273_p13, %p2621_p8 }
  0xdc   : > { %p2276_p1 = pneg %p2275_p0 }
  0xde   : > { %p2281_p2 = pnand %p2279_p3, %p2276_p1 }
  0xe0   : > { %2284 = shalt.err (!%p2281_p2)
}
  0xe1   : > { %s2285_s17 = scalar_lea.vmem %s416_s1, 256  ;;  %p2293_p10 = scmp.lt.s32.totalorder %s416_s1, %s416_s1 }
  0xe2   : > { %p2286_p5 = scmp.ne.s32.totalorder %s416_s1, %s2285_s17  ;;  %p2294_p11 = scmp.lt.s32.totalorder %s2285_s17, %s2285_s17 }
  0xe4   : > { %p2288_p7 = pnand %p2286_p5, %p2621_p8  ;;  %p2295_p12 = por %p2294_p11, %p2293_p10 }
  0xe6   : > { %p2289_p9 = pneg %p2288_p7 }
  0xe8   : > { %p2296_p4 = pnand %p2295_p12, %p2289_p9 }
  0xea   : > { %2299 = shalt.err (!%p2296_p4)
}
  0xeb   : > { %1913 = dma.hbm_to_vmem [thread:$0]  (!%p2607_p6), %s3111_s8, 256, %s416_s1, [#allocation16], %s3137_s12, %s3137_s12, %s3136_s28  }
  0xec   : > { %s2489_s2 = smov [#allocation20]   ;;  %s2490_s3 = smov [#allocation21]  }
  0xed   : > { %s439_s26 = sshll.u32 %s2489_s2, 4  ;;  %s453_s18 = sshll.u32 %s2490_s3, 4  ;;  %s440_s26 = int_to_ptr.vmem [resolvable:$true] %s439_s26  ;;  %s454_s18 = int_to_ptr.vmem [resolvable:$true] %s453_s18 }
  0xee   : > { %s2300_s19 = scalar_lea.hbm %s3113_s10, 1024 }
  0xef   : > { %p2301_p13 = scmp.ne.s32.totalorder %s3113_s10, %s2300_s19  ;;  %p2307_p3 = scmp.lt.u32.totalorder %s2300_s19, %s3113_s10 }
  0xf1   : > { %p2303_p0 = pnand %p2301_p13, %p2621_p8 }
  0xf3   : > { %p2304_p1 = pneg %p2303_p0 }
  0xf5   : > { %p2309_p2 = pnand %p2307_p3, %p2304_p1 }
  0xf7   : > { %2312 = shalt.err (!%p2309_p2)
}
  0xf8   : > { %s2313_s1 = scalar_lea.vmem %s440_s26, 1024  ;;  %p2321_p10 = scmp.lt.s32.totalorder %s440_s26, %s440_s26 }
  0xf9   : > { %p2314_p5 = scmp.ne.s32.totalorder %s440_s26, %s2313_s1  ;;  %p2322_p11 = scmp.lt.s32.totalorder %s2313_s1, %s2313_s1 }
  0xfb   : > { %p2316_p7 = pnand %p2314_p5, %p2621_p8  ;;  %p2323_p12 = por %p2322_p11, %p2321_p10 }
  0xfd   : > { %p2317_p9 = pneg %p2316_p7 }
  0xff   : > { %p2324_p4 = pnand %p2323_p12, %p2317_p9 }
 0x101   : > { %2327 = shalt.err (!%p2324_p4)
}
 0x102   : > { %1919 = dma.hbm_to_vmem [thread:$0]  (!%p2607_p6), %s3113_s10, 1024, %s440_s26, [#allocation19], %s3137_s12, %s3137_s12, %s3136_s28  }
 0x103   : > { %s2328_s29 = scalar_lea.hbm %s3114_s11, 16 }
 0x104   : > { %p2329_p13 = scmp.ne.s32.totalorder %s3114_s11, %s2328_s29  ;;  %p2335_p3 = scmp.lt.u32.totalorder %s2328_s29, %s3114_s11 }
 0x106   : > { %p2331_p0 = pnand %p2329_p13, %p2621_p8 }
 0x108   : > { %p2332_p1 = pneg %p2331_p0 }
 0x10a   : > { %p2337_p2 = pnand %p2335_p3, %p2332_p1 }
 0x10c   : > { %2340 = shalt.err (!%p2337_p2)
}
 0x10d   : > { %s2341_s30 = scalar_lea.vmem %s454_s18, 16  ;;  %s2348_s28 = scalar_lea.vmem %s454_s18, 32 }
 0x10e   : > { %p2342_p5 = scmp.ne.s32.totalorder %s454_s18, %s2341_s30  ;;  %p2349_p10 = scmp.lt.s32.totalorder %s454_s18, %s454_s18 }
 0x10f   : > { %p2350_p11 = scmp.lt.s32.totalorder %s2348_s28, %s2341_s30 }
 0x110   : > { %p2344_p7 = pnand %p2342_p5, %p2621_p8 }
 0x111   : > { %p2351_p12 = por %p2350_p11, %p2349_p10 }
 0x112   : > { %p2345_p9 = pneg %p2344_p7 }
 0x114   : > { %p2352_p4 = pnand %p2351_p12, %p2345_p9 }
 0x116   : > { %2355 = shalt.err (!%p2352_p4)
}
 0x117   : > { %1922 = dma.hbm_to_vmem [thread:$0]  (!%p2607_p6), %s3114_s11, 16, %s454_s18, [#allocation22]  }
 0x118   : > { %s1649_s25 = sadd.s32 4294967294, %s2476_s24   ;;  %s2848_s13 = sadd.s32 1, %s2476_s24  }
 0x119   : > { %s41_s1 = sadd.s32 1, %s2472_s23  ;;  %s38_s14 = ssub.s32 %s2476_s24, %s2848_s13 }
 0x11a   : > { %p48_p8 = scmp.ne.s32.totalorder %s2472_s23, %s2468_s22  ;;  %p39_p13 = scmp.eq.s32.totalorder %s38_s14, 0 }
 0x11b   : > { %p49_p0 = scmp.eq.s32.totalorder %s2476_s24, 0  ;;  %p54_p1 = scmp.ne.s32.totalorder %s2468_s22, %s2464_s21 }
 0x11c   : > { %p309_p3 = scmp.eq.s32.totalorder %s2589_s27, 1  ;;  %p3138_p5 = scmp.eq.s32.totalorder %s2589_s27, 0 }
 0x11d   : > { %s2860_s2 = scalar_select %p39_p13, %s2472_s23, %s41_s1  }
 0x11e   : > { %p50_p2 = por %p49_p0, %p48_p8  ;;  %p2864_p7 = por %p3138_p5, %p54_p1 }
 0x11f   : > { %p2868_p6 = por %p309_p3, %p48_p8  ;;  %p315_p9 = scmp.eq.s32.totalorder %s1649_s25, 1 }
 0x120   : > { %p1942_p10 = scmp.lt.s32.totalorder %s2476_s24, 2  ;;  %s464_s15 = sand.u32 1, %s2472_s23  }
 0x121   : > { %s3140_s18 = scalar_select %p2868_p6, 1, 0 }
 0x122   : > { %p2874_p11 = por %p315_p9, %p54_p1  ;;  %s1663_s19 = sshll.u32 %s464_s15, 3 }
 0x123   : > { %s1664_s16 = sshll.u32 %s2476_s24, 7  ;;  %s468_s28 = scalar_lea.vmem [#allocation3], %s1663_s19 }
 0x124   : > { %s3141_s29 = scalar_select %p2874_p11, 1, 0 }
 0x125   : > { %s2882_s30 = scalar_lea.hbm %s3103_s0, %s1664_s16  ;;  %s475_s12 = sshll.u32 %s468_s28, 4  ;;  %s2888_s12 = int_to_ptr.vmem [resolvable:$true] %s475_s12 }
 0x126   : > { %p2884_p12 = pnand %p1942_p10, %p50_p2  ;;  %s465_s25 = scalar_lea.sflag [#allocation4], %s464_s15 }
 0x127   : > { %s2356_s1 = scalar_lea.hbm %s2882_s30, 128  ;;  %s2361_s16 = scalar_lea.hbm %s3103_s0, 256 }
 0x128   : > { %p2357_p4 = scmp.ne.s32.totalorder %s2882_s30, %s2356_s1  ;;  %p2358_p8 = pneg %p2884_p12 }
 0x129   : > { %p2362_p1 = scmp.lt.u32.totalorder %s2882_s30, %s3103_s0  ;;  %p2363_p3 = scmp.lt.u32.totalorder %s2361_s16, %s2356_s1 }
 0x12a   : > { %p2359_p13 = pnand %p2358_p8, %p2357_p4  ;;  %p2365_p5 = scmp.lt.u32.totalorder %s2356_s1, %s2882_s30 }
 0x12b   : > { %p2364_p2 = por %p2363_p3, %p2362_p1 }
 0x12c   : > { %p2360_p0 = pneg %p2359_p13 }
 0x12d   : > { %p2366_p9 = por %p2365_p5, %p2364_p2 }
 0x12f   : > { %p2367_p10 = pnand %p2366_p9, %p2360_p0 }
 0x131   : > { %2370 = shalt.err (!%p2367_p10)
}
 0x132   : > { %s2371_s15 = scalar_lea.vmem %s2888_s12, 128  ;;  %s2491_s28 = smov [#allocation3]  }
 0x133   : > { %p2372_p4 = scmp.ne.s32.totalorder %s2888_s12, %s2371_s15  ;;  %s2376_s14 = sshll.u32 %s2491_s28, 4  ;;  %s2377_s14 = int_to_ptr.vmem [resolvable:$false] %s2376_s14 }
 0x134   : > { %s2378_s19 = scalar_lea.vmem %s2377_s14, 256  ;;  %p2379_p6 = scmp.lt.s32.totalorder %s2888_s12, %s2377_s14 }
 0x135   : > { %p2374_p13 = pnand %p2372_p4, %p2358_p8  ;;  %p2380_p1 = scmp.lt.s32.totalorder %s2378_s19, %s2371_s15 }
 0x137   : > { %p2375_p11 = pneg %p2374_p13  ;;  %p2381_p3 = por %p2380_p1, %p2379_p6 }
 0x139   : > { %p2382_p2 = pnand %p2381_p3, %p2375_p11 }
 0x13b   : > { %2385 = shalt.err (!%p2382_p2)
}
 0x13c   : > { %1926 = dma.hbm_to_vmem [thread:$0]  (!%p2884_p12), %s2882_s30, 128, %s2888_s12, %s465_s25  }
 0x13d   : > { %s3143_s1 = sld [smem:[#allocation32_spill]] }
 0x143   : > { %p3144_p0 = scmp.ne.s32.totalorder %s3143_s1, 0 }
 0x144   : > { %s2918_s16 = sand.u32 (!%p3144_p0), 1, %s2468_s22  }
 0x145   : > { %484 = sbr.rel (%p3144_p0) target bundleno = 2865 (0xb31), region = 68  ;;  %s1666_s20 = sshll.u32 (!%p3144_p0), %s2918_s16, 3 }
 0x146   : > { %s487_s17 = scalar_lea.sflag (!%p3144_p0), [#allocation4], %s2918_s16  ;;  %s490_s15 = scalar_lea.vmem (!%p3144_p0), [#allocation3], %s1666_s20 }
 0x14c   : > { %2431 = dma.done.wait (%p2864_p7), %s487_s17, 128  }
 0x14d   : > { %2433 = vsyncadd (%p2864_p7), %s487_s17, 4294967168  ;;  %p3145_p6 = scmp.eq.s32.totalorder %s2589_s27, 0 }
 0x14f   : > { %2435 = dma.done.wait (%p3145_p6), [#allocation7], 32   ;;  %p3146_p11 = pmov %p3145_p6 }
 0x150   : > { %p3147_p12 = pmov %p3145_p6 }
 0x151   : > { %2437 = vsyncadd (%p3146_p11), [#allocation7], 4294967264 }
 0x152   : > { %2439 = dma.done.wait (%p3147_p12), [#allocation10], 512   ;;  %p3148_p8 = pmov %p3145_p6 }
 0x153   : > { %p3149_p5 = pmov %p3145_p6 }
 0x154   : > { %2441 = vsyncadd (%p3148_p8), [#allocation10], 4294966784 }
 0x155   : > { %2443 = dma.done.wait (%p3149_p5), [#allocation13], 32   ;;  %p3150_p9 = pmov %p3149_p5 }
 0x156   : > { %p3151_p7 = pmov %p3149_p5 }
 0x157   : > { %2445 = vsyncadd (%p3150_p9), [#allocation13], 4294967264 }
 0x158   : > { %2447 = dma.done.wait (%p3151_p7), [#allocation16], 272   ;;  %p3152_p10 = pmov %p3149_p5 }
 0x159   : > { %p3153_p4 = pmov %p3149_p5 }
 0x15a   : > { %2449 = vsyncadd (%p3152_p10), [#allocation16], 4294967024 }
 0x15b   : > { %2451 = dma.done.wait (%p3153_p4), [#allocation19], 1040   ;;  %p3154_p13 = pmov %p3153_p4 }
 0x15c   : > { %p3155_p1 = pmov %p3153_p4 }
 0x15d   : > { %2453 = vsyncadd (%p3154_p13), [#allocation19], 4294966256 }
 0x15e   : > { %2455 = dma.done.wait (%p3155_p1), [#allocation22], 16   ;;  %p3156_p3 = pmov %p3155_p1 }
 0x15f   : > { %vm579_vm0 = vcmask 261120   ;;  %v2952_v0 = vld [vmem:[%s490_s15] sm:$0xff]  ;;  %v2010_v7 = vld [vmem:[#allocation9] sm:$0xff]   ;;  %v2492_v8 = vmov 0.0   ;;  %vm2493_vm1 = vmmov 0   ;;  %s2494_s3 = smov 104  }
 0x160   : > { %2457 = vsyncadd (%p3156_p3), [#allocation22], 4294967280  ;;  %v580_v1 = vsel %vm579_vm0, %v2952_v0, 0.0  ;;  %1749 = vmatprep.subr.bf16.mxu0 %v2492_v8  ;;  %1753 = vmatprep.mubr.msk.bf16.mxu0 %vm2493_vm1, %v2492_v8  ;;  %v2011_v9 = vld [vmem:[#allocation9 + $0x8] sm:$0xff]   ;;  %v1679_v14 = vld [vmem:[#allocation6] ss:$0 sm:$0xff] }
 0x161   : > { %581 = vadd.xlane.f32.xlu0 %v580_v1  ;;  %1750 = vmatpush3.bf16.msra.mxu0 %v2010_v7  ;;  %v1680_v16 = vld [vmem:[#allocation8] ss:$0 sm:$0xff]  ;;  %s2495_s30 = smov 120   ;;  %s2496_s12 = smov 112   ;;  %vm700_vm2 = vcmask 64512   ;;  %vm939_vm3 = vcmask 1043456  }
 0x162   : > { %1769 = vmatprep.subr.bf16.mxu1 %v2492_v8  ;;  %1751 = vmatprep.subr.bf16.mxu0 %v2492_v8  ;;  %s2497_s26 = smov 96   ;;  %s2498_s25 = smov 64   ;;  %vm1140_vm4 = vcmask 130112   ;;  %vm1146_vm5 = vcmask 195712   ;;  %vm1152_vm6 = vcmask 261312  }
 0x163   : > { %1771 = vmatprep.mubr.msk.bf16.mxu1 %vm2493_vm1, %v2492_v8  ;;  %s2499_s28 = smov 8   ;;  %s2500_s14 = smov 16  }
 0x164   : > { %s2501_s19 = smov 24   ;;  %s1712_s1 = sshll.u32 %s2589_s27, 7 }
 0x165   : > { %1752 = vmatpush3.bf16.msra.mxu0 %v2011_v9  ;;  %s574_s17 = scalar_lea.vmem [#allocation23], %s1666_s20  ;;  %s1461_s27 = scalar_lea.sflag [#allocation5], %s2918_s16 }
 0x166   : > { %1757 = vmatprep.subr.bf16.mxu0 %v2492_v8  ;;  %s1474_s15 = sshll.u32 %s574_s17, 4  ;;  %p3158_p0 = scmp.ne.s32.totalorder %s3140_s18, 0  ;;  %s3060_s15 = int_to_ptr.vmem [resolvable:$true] %s1474_s15 }
 0x167   : > { %s2386_s20 = scalar_lea.vmem %s3060_s15, 128 }
 0x168   : > { %p2387_p2 = scmp.ne.s32.totalorder %s3060_s15, %s2386_s20 }
 0x16a   : > { %p2388_p6 = pnand %p2387_p2, %p3158_p0 }
 0x16c   : > { %p2389_p11 = pneg %p2388_p6 }
 0x1ee   : > { %v582_v2 = vpop.xlane.xlu0 %581 }
 0x1ef   : > { %v584_v3 = vmul.f32 0.03125, %v582_v2 }
 0x1f1   : > { %v585_v4 = vsub.f32 %v2952_v0, %v584_v3 }
 0x1f3   : > { %v586_v5 = vmul.f32 %v585_v4, %v585_v4 }
 0x1f5   : > { %v587_v6 = vsel %vm579_vm0, %v586_v5, 0.0 }
 0x1f6   : > { %588 = vadd.xlane.f32.xlu0 %v587_v6 }
 0x283   : > { %v589_v10 = vpop.xlane.xlu0 %588 }
 0x284   : > { %v590_v11 = vmul.f32 0.03125, %v589_v10 }
 0x286   : > { %v591_v12 = vadd.f32 1e-05, %v590_v11 }
 0x288   : > { %2024 = vrsqrt.f32 %v591_v12 }
 0x292   : > { %v2025_v13 = vpop.eup %2024 }
 0x293   : > { %v593_v15 = vmul.f32 %v2025_v13, %v585_v4 }
 0x295   : > { %v600_v17 = vmul.f32 %v1679_v14, %v593_v15 }
 0x297   : > { %v607_v18 = vadd.f32 %v1680_v16, %v600_v17 }
 0x299   : > { %v608_v19 = vpack.c.bf16 %v607_v18, %v607_v18 }
 0x29b   : > { %1754 = vmatmul.mubr.msk.bf16.vlgmr.msra.gmra.mrb[0].mxu0 %vm579_vm0, %v608_v19 }
 0x29c   : > { %1759 = vmatprep.mubr.msk.bf16.mxu0 %vm2493_vm1, %v2492_v8 }
 0x36e   : > { %v662_v20 = vpop.f32.mrb[0].mxu0 }
 0x36f   : > { %690 = vrot.lane.b32.xlu0 %v662_v20, %s2494_s3  ;;  %684 = vrot.lane.b32.xlu1 %v662_v20, %s2495_s30  ;;  %v1755_v21 = vpop.f32.mrb[1].mxu0  ;;  %v668_v24 = vmul.f32 0.35355338, %v662_v20  ;;  %v693_v25 = vpack.c.bf16 %v662_v20, %v662_v20 }
 0x370   : > { %v665_v22 = vpop.f32.mrb[2].mxu0 }
 0x371   : > { %v1756_v23 = vpop.f32.mrb[3].mxu0  ;;  %v679_v34 = vpack.c.bf16 %v668_v24, %v668_v24 }
 0x373   : > { %687 = vrot.lane.b32.xlu1 %v662_v20, %s2496_s12  ;;  %676 = vrot.lane.b32.xlu0 %v668_v24, %s2494_s3 }
 0x377   : > { %698 = vrot.lane.b32.xlu1 %v693_v25, %s2497_s26  ;;  %934 = vrot.lane.b32.xlu0 %v693_v25, %s2498_s25 }
 0x37b   : > { %670 = vrot.lane.b32.xlu1 %v668_v24, %s2495_s30 }
 0x3e1   : > { %v685_v26 = vpop.permute.xlu1 %684  ;;  %v691_v30 = vpop.permute.xlu0 %690 }
 0x3e2   : > { %v694_v27 = vpack.c.bf16 %v685_v26, %v685_v26  ;;  %v2973_v32 = vpack.c.bf16 %v691_v30, %v691_v30 }
 0x3e4   : > { %748 = vrot.lane.b32.xlu1 %v694_v27, %s2497_s26 }
 0x3e5   : > { %v688_v28 = vpop.permute.xlu1 %687  ;;  %v677_v40 = vpop.permute.xlu0 %676 }
 0x3e6   : > { %v2970_v29 = vpack.c.bf16 %v688_v28, %v688_v28  ;;  %v682_v47 = vpack.c.bf16 %v677_v40, %v677_v40 }
 0x3e8   : > { %797 = vrot.lane.b32.xlu1 %v2970_v29, %s2497_s26 }
 0x3e9   : > { %v699_v31 = vpop.permute.xlu1 %698  ;;  %v935_v44 = vpop.permute.xlu0 %934 }
 0x3ea   : > { %v705_v33 = vsel %vm700_vm2, %v699_v31, 0  ;;  %v941_v48 = vsel %vm939_vm3, %v935_v44, 0 }
 0x3eb   : > { %1758 = vmatpush3.bf16.xpose.msra.mxu0 %v705_v33 }
 0x3ec   : > { %846 = vrot.lane.b32.xlu1 %v2973_v32, %s2497_s26  ;;  %1763 = vmatprep.subr.bf16.mxu0 %v2492_v8 }
 0x3ed   : > { %v671_v35 = vpop.permute.xlu1 %670 }
 0x3ee   : > { %v680_v41 = vpack.c.bf16 %v671_v35, %v671_v35 }
 0x3f0   : > { %673 = vrot.lane.b32.xlu1 %v668_v24, %s2496_s12  ;;  %s3157_s12 = sld [smem:[#allocation36_spill]] }
 0x3f2   : > { %1760 = vmatmul.mubr.msk.bf16.vlgmr.msra.gmra.mrb[4].mxu0 %vm700_vm2, %v679_v34 }
 0x3f3   : > { %1765 = vmatprep.mubr.msk.bf16.mxu0 %vm2493_vm1, %v2492_v8 }
 0x3f4   : > { %983 = vrot.lane.b32.xlu1 %v694_v27, %s2498_s25 }
 0x3f6   : > { %s3058_s26 = scalar_lea.hbm %s3157_s12, %s1712_s1 }
 0x456   : > { %v749_v36 = vpop.permute.xlu1 %748 }
 0x457   : > { %v754_v37 = vsel %vm700_vm2, %v749_v36, 0 }
 0x458   : > { %1764 = vmatpush3.bf16.xpose.msra.mxu0 %v754_v37 }
 0x459   : > { %1775 = vmatprep.subr.bf16.mxu0 %v2492_v8 }
 0x45a   : > { %v798_v38 = vpop.permute.xlu1 %797 }
 0x45b   : > { %v803_v39 = vsel %vm700_vm2, %v798_v38, 0 }
 0x45c   : > { %1770 = vmatpush3.bf16.xpose.msra.mxu1 %v803_v39 }
 0x45d   : > { %1781 = vmatprep.subr.bf16.mxu1 %v2492_v8 }
 0x45e   : > { %v847_v42 = vpop.permute.xlu1 %846 }
 0x45f   : > { %v852_v43 = vsel %vm700_vm2, %v847_v42, 0  ;;  %1766 = vmatmul.mubr.msk.bf16.vlgmr.msra.gmra.mrb[8].mxu0 %vm700_vm2, %v680_v41 }
 0x460   : > { %1776 = vmatpush3.bf16.xpose.msra.mxu0 %v852_v43  ;;  %1777 = vmatprep.mubr.msk.bf16.mxu0 %vm2493_vm1, %v2492_v8 }
 0x461   : > { %1787 = vmatprep.subr.bf16.mxu0 %v2492_v8 }
 0x462   : > { %v674_v45 = vpop.permute.xlu1 %673 }
 0x463   : > { %v681_v46 = vpack.c.bf16 %v674_v45, %v674_v45 }
 0x465   : > { %1772 = vmatmul.mubr.msk.bf16.vlgmr.msra.gmra.mrb[0].mxu1 %vm700_vm2, %v681_v46 }
 0x466   : > { %1782 = vmatpush3.bf16.msra.mxu1 %v941_v48  ;;  %v984_v49 = vpop.permute.xlu1 %983  ;;  %1783 = vmatprep.mubr.msk.bf16.mxu1 %vm2493_vm1, %v2492_v8 }
 0x467   : > { %v989_v50 = vsel %vm939_vm3, %v984_v49, 0  ;;  %1778 = vmatmul.mubr.msk.bf16.vlgmr.msra.gmra.mrb[12].mxu0 %vm700_vm2, %v682_v47  ;;  %1793 = vmatprep.subr.bf16.mxu1 %v2492_v8  ;;  %v2012_v49 = vld [vmem:[#allocation11] sm:$0xff]  }
 0x468   : > { %1788 = vmatpush3.bf16.msra.mxu0 %v989_v50  ;;  %1789 = vmatprep.mubr.msk.bf16.mxu0 %vm2493_vm1, %v2492_v8 }
 0x469   : > { %1799 = vmatprep.subr.bf16.mxu0 %v2492_v8 }
 0x4c5   : > { %v741_v51 = vpop.f32.mrb[4].mxu0 }
 0x4c6   : > { %v1761_v52 = vpop.f32.mrb[5].mxu0  ;;  %v894_v53 = vsel %vm700_vm2, %v741_v51, -inf }
 0x4c7   : > { %895 = vmax.xlane.f32.xlu1 %v894_v53  ;;  %v744_v54 = vpop.f32.mrb[6].mxu0  ;;  %v2013_v53 = vld [vmem:[#allocation11 + $0x8] sm:$0xff]  }
 0x4c8   : > { %v1762_v55 = vpop.f32.mrb[7].mxu0 }
 0x532   : > { %v790_v56 = vpop.f32.mrb[8].mxu0 }
 0x533   : > { %v1767_v57 = vpop.f32.mrb[9].mxu0  ;;  %v897_v58 = vsel %vm700_vm2, %v790_v56, -inf }
 0x534   : > { %898 = vmax.xlane.f32.xlu0 %v897_v58  ;;  %v793_v59 = vpop.f32.mrb[10].mxu0 }
 0x535   : > { %v1768_v60 = vpop.f32.mrb[11].mxu0 }
 0x538   : > { %v839_v61 = vpop.f32.mrb[0].mxu1 }
 0x539   : > { %v1773_v62 = vpop.f32.mrb[1].mxu1  ;;  %v900_v63 = vsel %vm700_vm2, %v839_v61, -inf }
 0x53a   : > { %v842_v1 = vpop.f32.mrb[2].mxu1  ;;  %901 = vmax.xlane.f32.xlu0 %v900_v63  ;;  %v888_v2 = vpop.f32.mrb[12].mxu0 }
 0x53b   : > { %v1774_v3 = vpop.f32.mrb[3].mxu1  ;;  %v1779_v4 = vpop.f32.mrb[13].mxu0  ;;  %v903_v5 = vsel %vm700_vm2, %v888_v2, -inf }
 0x53c   : > { %904 = vmax.xlane.f32.xlu1 %v903_v5  ;;  %v891_v6 = vpop.f32.mrb[14].mxu0 }
 0x53d   : > { %v1780_v7 = vpop.f32.mrb[15].mxu0 }
 0x54d   : > { %1031 = vrot.lane.b32.xlu1 %v2970_v29, %s2498_s25 }
 0x550   : > { %1079 = vrot.lane.b32.xlu0 %v2973_v32, %s2498_s25  ;;  %s2502_s25 = smov [#allocation23]  }
 0x554   : > { %v896_v9 = vpop.xlane.xlu1 %895 }
 0x555   : > { %v906_v10 = vsub.f32 %v741_v51, %v896_v9 }
 0x557   : > { %v910_v11 = vmul.f32 1.442695, %v906_v10  ;;  %v1692_v10 = vld [vmem:[#allocation12] ss:$0 sm:$0xff] }
 0x559   : > { %2026 = vpow2.f32 %v910_v11 }
 0x563   : > { %v2027_v12 = vpop.eup %2026 }
 0x564   : > { %v930_v13 = vpack.c.bf16 %v2027_v12, %v2027_v12  ;;  %v918_v30 = vsel %vm700_vm2, %v2027_v12, 0.0 }
 0x566   : > { %1784 = vmatmul.mubr.msk.bf16.vlgmr.msra.gmra.mrb[4].mxu1 %vm700_vm2, %v930_v13 }
 0x567   : > { %1795 = vmatprep.mubr.msk.bf16.mxu1 %vm2493_vm1, %v2492_v8 }
 0x5c1   : > { %v899_v14 = vpop.xlane.xlu0 %898 }
 0x5c2   : > { %v907_v15 = vsub.f32 %v790_v56, %v899_v14 }
 0x5c4   : > { %v912_v16 = vmul.f32 1.442695, %v907_v15 }
 0x5c6   : > { %2028 = vpow2.f32 %v912_v16 }
 0x5c7   : > { %v902_v17 = vpop.xlane.xlu0 %901 }
 0x5c8   : > { %v908_v18 = vsub.f32 %v839_v61, %v902_v17 }
 0x5c9   : > { %v905_v19 = vpop.xlane.xlu1 %904 }
 0x5ca   : > { %v914_v20 = vmul.f32 1.442695, %v908_v18  ;;  %v909_v21 = vsub.f32 %v888_v2, %v905_v19 }
 0x5cb   : > { %v1080_v26 = vpop.permute.xlu0 %1079 }
 0x5cc   : > { %2030 = vpow2.f32 %v914_v20  ;;  %v916_v22 = vmul.f32 1.442695, %v909_v21  ;;  %v1085_v29 = vsel %vm939_vm3, %v1080_v26, 0 }
 0x5cd   : > { %v1032_v23 = vpop.permute.xlu1 %1031 }
 0x5ce   : > { %2032 = vpow2.f32 %v916_v22  ;;  %v1037_v24 = vsel %vm939_vm3, %v1032_v23, 0  ;;  %v2014_v23 = vld [vmem:[#allocation17] sm:$0xff]  }
 0x5cf   : > { %1794 = vmatpush3.bf16.msra.mxu1 %v1037_v24  ;;  %v2015_v24 = vld [vmem:[#allocation17 + $0x8] sm:$0xff]  }
 0x5d0   : > { %v2029_v25 = vpop.eup %2028  ;;  %1805 = vmatprep.subr.bf16.mxu1 %v2492_v8 }
 0x5d1   : > { %v921_v27 = vsel %vm700_vm2, %v2029_v25, 0.0  ;;  %v931_v28 = vpack.c.bf16 %v2029_v25, %v2029_v25 }
 0x5d2   : > { %922 = vadd.xlane.f32.xlu1 %v921_v27 }
 0x5d3   : > { %1790 = vmatmul.mubr.msk.bf16.vlgmr.msra.gmra.mrb[16].mxu0 %vm700_vm2, %v931_v28  ;;  %v1696_v28 = vld [vmem:[#allocation14] ss:$0 sm:$0xff] }
 0x5d4   : > { %1800 = vmatpush3.bf16.msra.mxu0 %v1085_v29  ;;  %1801 = vmatprep.mubr.msk.bf16.mxu0 %vm2493_vm1, %v2492_v8 }
 0x5d5   : > { %1813 = vmatprep.subr.bf16.mxu0 %v2492_v8 }
 0x5d6   : > { %v2031_v31 = vpop.eup %2030  ;;  %919 = vadd.xlane.f32.xlu1 %v918_v30  ;;  %v1697_v30 = vld [vmem:[#allocation15] ss:$0 sm:$0xff] }
 0x5d7   : > { %v924_v32 = vsel %vm700_vm2, %v2031_v31, 0.0  ;;  %v932_v33 = vpack.c.bf16 %v2031_v31, %v2031_v31 }
 0x5d8   : > { %v2033_v34 = vpop.eup %2032  ;;  %925 = vadd.xlane.f32.xlu0 %v924_v32 }
 0x5d9   : > { %1796 = vmatmul.mubr.msk.bf16.vlgmr.msra.gmra.mrb[8].mxu1 %vm700_vm2, %v932_v33  ;;  %v933_v35 = vpack.c.bf16 %v2033_v34, %v2033_v34  ;;  %v927_v36 = vsel %vm700_vm2, %v2033_v34, 0.0  ;;  %v2016_v34 = vld [vmem:[#allocation20] sm:$0xff]  }
 0x5da   : > { %1809 = vmatprep.mubr.msk.bf16.mxu1 %vm2493_vm1, %v2492_v8  ;;  %1806 = vmatpush3.bf16.msra.mxu1 %v2012_v49 }
 0x5db   : > { %1802 = vmatmul.mubr.msk.bf16.vlgmr.msra.gmra.mrb[20].mxu0 %vm700_vm2, %v933_v35  ;;  %1807 = vmatprep.subr.bf16.mxu1 %v2492_v8  ;;  %v2017_v35 = vld [vmem:[#allocation20 + $0x8] sm:$0xff]  }
 0x5dc   : > { %928 = vadd.xlane.f32.xlu0 %v927_v36  ;;  %1817 = vmatprep.mubr.msk.bf16.mxu0 %vm2493_vm1, %v2492_v8  ;;  %v2018_v36 = vld [vmem:[#allocation20 + $0x10] sm:$0xff]  }
 0x5dd   : > { %1814 = vmatpush3.bf16.msra.mxu0 %v2014_v23 }
 0x5de   : > { %1808 = vmatpush3.bf16.msra.mxu1 %v2013_v53  ;;  %1815 = vmatprep.subr.bf16.mxu0 %v2492_v8 }
 0x5df   : > { %1821 = vmatprep.subr.bf16.mxu1 %v2492_v8 }
 0x5e1   : > { %1816 = vmatpush3.bf16.msra.mxu0 %v2015_v24 }
 0x639   : > { %v977_v37 = vpop.f32.mrb[4].mxu1 }
 0x63a   : > { %v1785_v38 = vpop.f32.mrb[5].mxu1 }
 0x63b   : > { %v980_v39 = vpop.f32.mrb[6].mxu1  ;;  %v2020_v38 = vld [vmem:[#allocation20 + $0x20] sm:$0xff]  }
 0x63c   : > { %v1786_v40 = vpop.f32.mrb[7].mxu1  ;;  %v2021_v39 = vld [vmem:[#allocation20 + $0x28] sm:$0xff]  }
 0x63d   : > { %v2022_v40 = vld [vmem:[#allocation20 + $0x30] sm:$0xff]  }
 0x65f   : > { %v923_v41 = vpop.xlane.xlu1 %922 }
 0x663   : > { %v920_v42 = vpop.xlane.xlu1 %919 }
 0x664   : > { %2034 = vrcp.f32 %v920_v42  ;;  %v1698_v42 = vld [vmem:[#allocation18] ss:$0 sm:$0xff] }
 0x665   : > { %2036 = vrcp.f32 %v923_v41  ;;  %v926_v45 = vpop.xlane.xlu0 %925  ;;  %v2023_v41 = vld [vmem:[#allocation20 + $0x38] sm:$0xff]  }
 0x666   : > { %2038 = vrcp.f32 %v926_v45 }
 0x669   : > { %v929_v46 = vpop.xlane.xlu0 %928 }
 0x66a   : > { %2040 = vrcp.f32 %v929_v46 }
 0x66e   : > { %v2035_v43 = vpop.eup %2034 }
 0x66f   : > { %v1131_v44 = vmul.f32 %v2035_v43, %v977_v37  ;;  %v2037_v47 = vpop.eup %2036  ;;  %v2019_v37 = vld [vmem:[#allocation20 + $0x18] sm:$0xff]  }
 0x670   : > { %v2039_v55 = vpop.eup %2038 }
 0x671   : > { %1135 = vst.msk [vmem:[#allocation2] sm:$0xff] %vm700_vm2, %v1131_v44 }
 0x674   : > { %v2041_v63 = vpop.eup %2040 }
 0x6a6   : > { %v1025_v48 = vpop.f32.mrb[16].mxu0 }
 0x6a7   : > { %v1132_v50 = vmul.f32 %v2037_v47, %v1025_v48  ;;  %v1791_v51 = vpop.f32.mrb[17].mxu0 }
 0x6a8   : > { %v1028_v52 = vpop.f32.mrb[18].mxu0 }
 0x6a9   : > { %1137 = vrot.lane.b32.xlu0 %v1132_v50, %s2499_s28  ;;  %v1792_v54 = vpop.f32.mrb[19].mxu0  ;;  %s2390_s28 = sshll.u32 %s2502_s25, 4  ;;  %s2391_s28 = int_to_ptr.vmem [resolvable:$false] %s2390_s28 }
 0x6aa   : > { %p2393_p12 = scmp.lt.s32.totalorder %s3060_s15, %s2391_s28 }
 0x6ac   : > { %v1073_v56 = vpop.f32.mrb[8].mxu1 }
 0x6ad   : > { %v1133_v57 = vmul.f32 %v2039_v55, %v1073_v56  ;;  %v1797_v58 = vpop.f32.mrb[9].mxu1 }
 0x6ae   : > { %v1076_v59 = vpop.f32.mrb[10].mxu1  ;;  %v1121_v60 = vpop.f32.mrb[20].mxu0 }
 0x6af   : > { %1143 = vrot.lane.b32.xlu1 %v1133_v57, %s2500_s14  ;;  %v1798_v61 = vpop.f32.mrb[11].mxu1  ;;  %v1803_v62 = vpop.f32.mrb[21].mxu0  ;;  %v1134_v2 = vmul.f32 %v2041_v63, %v1121_v60  ;;  %s2392_s14 = scalar_lea.vmem %s2391_s28, 256 }
 0x6b0   : > { %v1124_v1 = vpop.f32.mrb[22].mxu0  ;;  %p2394_p8 = scmp.lt.s32.totalorder %s2392_s14, %s2386_s20 }
 0x6b1   : > { %v1804_v3 = vpop.f32.mrb[23].mxu0 }
 0x6b2   : > { %p2395_p5 = por %p2394_p8, %p2393_p12 }
 0x6b3   : > { %1149 = vrot.lane.b32.xlu1 %v1134_v2, %s2501_s19 }
 0x6b4   : > { %p2396_p9 = pnand %p2395_p5, %p2389_p11 }
 0x71b   : > { %v1138_v4 = vpop.permute.xlu0 %1137 }
 0x71c   : > { %1141 = vst.msk [vmem:[#allocation2] sm:$0xff] %vm1140_vm4, %v1138_v4 }
 0x721   : > { %v1144_v5 = vpop.permute.xlu1 %1143 }
 0x722   : > { %1147 = vst.msk [vmem:[#allocation2] sm:$0xff] %vm1146_vm5, %v1144_v5 }
 0x725   : > { %v1150_v6 = vpop.permute.xlu1 %1149 }
 0x726   : > { %1153 = vst.msk [vmem:[#allocation2] sm:$0xff] %vm1152_vm6, %v1150_v6 }
 0x72d   : > { %v1154_v7 = vld [vmem:[#allocation2] sm:$0xff] }
 0x72e   : > { %v1155_v9 = vpack.c.bf16 %v1154_v7, %v1154_v7 }
 0x730   : > { %1810 = vmatmul.mubr.msk.bf16.vlgmr.msra.gmra.mrb[12].mxu1 %vm579_vm0, %v1155_v9 }
 0x731   : > { %1837 = vmatprep.mubr.msk.bf16.mxu1 %vm2493_vm1, %v2492_v8  ;;  %1822 = vmatpush3.bf16.msra.mxu1 %v2016_v34 }
 0x732   : > { %1823 = vmatprep.subr.bf16.mxu1 %v2492_v8 }
 0x735   : > { %1824 = vmatpush3.bf16.msra.mxu1 %v2017_v35 }
 0x736   : > { %1825 = vmatprep.subr.bf16.mxu1 %v2492_v8 }
 0x739   : > { %1826 = vmatpush3.bf16.msra.mxu1 %v2018_v36 }
 0x73a   : > { %1827 = vmatprep.subr.bf16.mxu1 %v2492_v8 }
 0x73d   : > { %1828 = vmatpush3.bf16.msra.mxu1 %v2019_v37 }
 0x73e   : > { %1829 = vmatprep.subr.bf16.mxu1 %v2492_v8 }
 0x741   : > { %1830 = vmatpush3.bf16.msra.mxu1 %v2020_v38 }
 0x742   : > { %1831 = vmatprep.subr.bf16.mxu1 %v2492_v8 }
 0x745   : > { %1832 = vmatpush3.bf16.msra.mxu1 %v2021_v39 }
 0x746   : > { %1833 = vmatprep.subr.bf16.mxu1 %v2492_v8 }
 0x749   : > { %1834 = vmatpush3.bf16.msra.mxu1 %v2022_v40 }
 0x74a   : > { %1835 = vmatprep.subr.bf16.mxu1 %v2492_v8 }
 0x74d   : > { %1836 = vmatpush3.bf16.msra.mxu1 %v2023_v41 }
 0x803   : > { %v1216_v11 = vpop.f32.mrb[12].mxu1 }
 0x804   : > { %v1217_v12 = vadd.f32 %v1692_v10, %v1216_v11  ;;  %v1811_v13 = vpop.f32.mrb[13].mxu1  ;;  %v1702_v11 = vld [vmem:[#allocation21] ss:$0 sm:$0xff] }
 0x805   : > { %v1219_v14 = vpop.f32.mrb[14].mxu1 }
 0x806   : > { %v3036_v15 = vadd.f32 %v1217_v12, %v2952_v0  ;;  %v1812_v16 = vpop.f32.mrb[15].mxu1 }
 0x808   : > { %v1225_v17 = vsel %vm579_vm0, %v3036_v15, 0.0 }
 0x809   : > { %1226 = vadd.xlane.f32.xlu0 %v1225_v17 }
 0x896   : > { %v1227_v18 = vpop.xlane.xlu0 %1226 }
 0x897   : > { %v1228_v19 = vmul.f32 0.03125, %v1227_v18 }
 0x899   : > { %v1229_v20 = vsub.f32 %v3036_v15, %v1228_v19 }
 0x89b   : > { %v1230_v21 = vmul.f32 %v1229_v20, %v1229_v20 }
 0x89d   : > { %v1231_v22 = vsel %vm579_vm0, %v1230_v21, 0.0 }
 0x89e   : > { %1232 = vadd.xlane.f32.xlu1 %v1231_v22 }
 0x92b   : > { %v1233_v0 = vpop.xlane.xlu1 %1232 }
 0x92c   : > { %v1234_v25 = vmul.f32 0.03125, %v1233_v0 }
 0x92e   : > { %v1235_v26 = vadd.f32 1e-05, %v1234_v25 }
 0x930   : > { %2042 = vrsqrt.f32 %v1235_v26 }
 0x93a   : > { %v2043_v27 = vpop.eup %2042 }
 0x93b   : > { %v1237_v29 = vmul.f32 %v2043_v27, %v1229_v20 }
 0x93d   : > { %v1244_v31 = vmul.f32 %v1696_v28, %v1237_v29 }
 0x93f   : > { %v1251_v32 = vadd.f32 %v1697_v30, %v1244_v31 }
 0x941   : > { %v1252_v33 = vpack.c.bf16 %v1251_v32, %v1251_v32 }
 0x943   : > { %1818 = vmatmul.mubr.msk.bf16.vlgmr.msra.gmra.mrb[24].mxu0 %vm579_vm0, %v1252_v33 }
 0xa16   : > { %v1313_v43 = vpop.f32.mrb[24].mxu0 }
 0xa17   : > { %v1314_v44 = vadd.f32 %v1698_v42, %v1313_v43  ;;  %v1819_v45 = vpop.f32.mrb[25].mxu0 }
 0xa18   : > { %v1316_v46 = vpop.f32.mrb[26].mxu0 }
 0xa19   : > { %v1320_v47 = vmul.f32 0.70710677, %v1314_v44  ;;  %v1820_v48 = vpop.f32.mrb[27].mxu0  ;;  %v1319_v6 = vmul.f32 0.5, %v1314_v44 }
 0xa1b   : > { %v1321_v49 = vand.u32 2147483647, %v1320_v47  ;;  %vm1341_vm7 = vcmp.ge.f32.partialorder %v1320_v47, 0.0 }
 0xa1d   : > { %v1322_v50 = vmul.f32 0.3275911, %v1321_v49  ;;  %v1335_v52 = vsub.f32 0.0, %v1321_v49 }
 0xa1f   : > { %v1323_v51 = vadd.f32 1.0, %v1322_v50  ;;  %v1336_v54 = vmul.f32 %v1335_v52, %v1321_v49 }
 0xa21   : > { %2044 = vrcp.f32 %v1323_v51  ;;  %v1337_v57 = vmul.f32 1.442695, %v1336_v54 }
 0xa23   : > { %2046 = vpow2.f32 %v1337_v57 }
 0xa2b   : > { %v2045_v53 = vpop.eup %2044 }
 0xa2c   : > { %v1326_v55 = vmul.f32 1.0614054, %v2045_v53 }
 0xa2d   : > { %v2047_v1 = vpop.eup %2046 }
 0xa2e   : > { %v1327_v56 = vadd.f32 -1.4531521, %v1326_v55 }
 0xa30   : > { %v1328_v8 = vmul.f32 %v2045_v53, %v1327_v56 }
 0xa32   : > { %v1329_v58 = vadd.f32 1.4214138, %v1328_v8 }
 0xa34   : > { %v1330_v59 = vmul.f32 %v2045_v53, %v1329_v58 }
 0xa36   : > { %v1331_v60 = vadd.f32 -0.28449672, %v1330_v59 }
 0xa38   : > { %v1332_v61 = vmul.f32 %v2045_v53, %v1331_v60 }
 0xa3a   : > { %v1333_v62 = vadd.f32 0.2548296, %v1332_v61 }
 0xa3c   : > { %v1334_v63 = vmul.f32 %v2045_v53, %v1333_v62 }
 0xa3e   : > { %v1339_v2 = vmul.f32 %v2047_v1, %v1334_v63 }
 0xa40   : > { %v1340_v3 = vsub.f32 1.0, %v1339_v2 }
 0xa42   : > { %v1342_v4 = vsub.f32 0.0, %v1340_v3 }
 0xa44   : > { %v1343_v5 = vsel %vm1341_vm7, %v1340_v3, %v1342_v4 }
 0xa45   : > { %v1344_v7 = vadd.f32 1.0, %v1343_v5 }
 0xa47   : > { %v1345_v9 = vmul.f32 %v1344_v7, %v1319_v6 }
 0xa49   : > { %v1346_v10 = vpack.c.bf16 %v1345_v9, %v1345_v9 }
 0xa4b   : > { %1838 = vmatmul.mubr.bf16.vlgmr.msra.gmra.mrb[16].mxu1 %v1346_v10 }
 0xb1e   : > { %v1452_v12 = vpop.f32.mrb[16].mxu1 }
 0xb1f   : > { %v1453_v13 = vadd.f32 %v1702_v11, %v1452_v12  ;;  %v1839_v14 = vpop.f32.mrb[17].mxu1 }
 0xb20   : > { %v1455_v16 = vpop.f32.mrb[18].mxu1 }
 0xb21   : > { %v1458_v17 = vadd.f32 %v1453_v13, %v3036_v15  ;;  %v1840_v18 = vpop.f32.mrb[19].mxu1 }
 0xb23   : > { %1459 = vst.msk [vmem:[%s574_s17] sm:$0xff] %vm579_vm0, %v1458_v17 }
 0xb24   : > { %2399 = shalt.err (!%p2396_p9)
}
 0xb25   : > { %s2400_s16 = scalar_lea.hbm %s3058_s26, 128  ;;  %s2404_s17 = scalar_lea.hbm %s3157_s12, 256 }
 0xb26   : > { %p2401_p7 = scmp.ne.s32.totalorder %s3058_s26, %s2400_s16  ;;  %p2405_p13 = scmp.lt.u32.totalorder %s3058_s26, %s3157_s12 }
 0xb27   : > { %p2406_p1 = scmp.lt.u32.totalorder %s2404_s17, %s2400_s16  ;;  %p2408_p2 = scmp.lt.u32.totalorder %s2400_s16, %s3058_s26 }
 0xb28   : > { %p2402_p10 = pnand %p2401_p7, %p3158_p0 }
 0xb29   : > { %p2407_p3 = por %p2406_p1, %p2405_p13 }
 0xb2a   : > { %p2403_p4 = pneg %p2402_p10 }
 0xb2b   : > { %p2409_p6 = por %p2408_p2, %p2407_p3 }
 0xb2d   : > { %p2410_p11 = pnand %p2409_p6, %p2403_p4 }
 0xb2f   : > { %2413 = shalt.err (!%p2410_p11)
}
 0xb30   : > { %1887 = dma.vmem_to_hbm [thread:$0]  (%p3158_p0), %s3060_s15, 128, %s3058_s26, %s1461_s27  }
 0xb31 PF: > { %s1486_s20 = sand.u32 1, %s2464_s21   ;;  %p3159_p12 = scmp.ne.s32.totalorder %s3141_s29, 0 }
 0xb32   : > { %p3160_p8 = scmp.ge.s32.totalorder %s2476_s24, 2  ;;  %s1487_s25 = scalar_lea.sflag [#allocation5], %s1486_s20 }
 0xb34   : > { %p1928_p5 = pnand %p3160_p8, %p3159_p12 }
 0xb36   : > { %2459 = dma.done.wait (!%p1928_p5), %s1487_s25, 128  }
 0xb37   : > { %2461 = vsyncadd (!%p1928_p5), %s1487_s25, 4294967168  ;;  %p31_p9 = scmp.ge.s32.totalorder %s2848_s13, 4   ;;  %s3161_s21 = smov %s2468_s22 }
 0xb38   : > { %s3162_s22 = smov %s2472_s23  ;;  %s3163_s23 = smov %s2860_s2 }
 0xb39   : > { %s3164_s24 = smov %s2848_s13  ;;  %33 = sbr.rel (!%p31_p9) target bundleno = 16 (0x10), region = 157 }
 0xb40   :  { %1492 = vsyncpa [#allocation4], 1 }
 0xb41   :  { %1494 = vsyncpa [#allocation4 + $0x1], 1 }
 0xb42   :  { %1495 = vsyncpa [#allocation7], 1 }
 0xb43   :  { %1496 = vsyncpa [#allocation10], 1 }
 0xb44   :  { %1497 = vsyncpa [#allocation13], 1 }
 0xb45   :  { %1498 = vsyncpa [#allocation16], 1 }
 0xb46   :  { %1499 = vsyncpa [#allocation19], 1 }
 0xb47   :  { %1500 = vsyncpa [#allocation22], 1 }
 0xb48   :  { %1501 = vsyncpa [#allocation5], 1 }
 0xb49   :  { %1503 = vsyncpa [#allocation5 + $0x1], 1 }

</bundles_post_ra>
